<compile_context>
chip_gen: v7x
topology: tpu7x:2x2x1
jax: 0.10.0
libtpu: 0.0.40
codegen_flags: <defaults>
</compile_context>

<pallas_src>
import jax
import jax.numpy as jnp
from jax import lax
from jax.experimental import pallas as pl
from jax.experimental.pallas import tpu as pltpu

VOCAB_SIZE = 26
HIDDEN_SIZE = 128


def lstm_kernel(x_ref, wih_ref, whh_ref, bg_ref, wout_ref, bout_ref,
                out_ref, gates_sc):
    # x_ref:    (S*B, V)   time-major, flattened (time major, batch minor)
    # wih_ref:  (V, 4H)
    # whh_ref:  (H, 4H)
    # bg_ref:   (1, 4H)    b_ih + b_hh
    # wout_ref: (H, V)
    # bout_ref: (1, V)
    # out_ref:  (B, V)
    # gates_sc: (S*B, 4H)  precomputed input-side gates (VMEM scratch)
    SB = x_ref.shape[0]
    H = whh_ref.shape[0]
    B = out_ref.shape[0]
    S = SB // B

    # Hoisted input projection + fused bias: ONE matmul for all time steps,
    # off the serial critical path of the recurrence.
    gates_sc[...] = (
        jnp.dot(x_ref[...], wih_ref[...], preferred_element_type=jnp.float32)
        + bg_ref[...])

    w_hh = whh_ref[...]  # resident across the whole loop

    def step(t, carry):
        h, c = carry
        row = pl.multiple_of(t * B, B)
        gates = (gates_sc[pl.ds(row, B), :]
                 + jnp.dot(h, w_hh, preferred_element_type=jnp.float32))
        # PyTorch LSTM gate order: i, f, g, o
        i_g = jax.nn.sigmoid(gates[:, 0:H])
        f_g = jax.nn.sigmoid(gates[:, H:2 * H])
        g_g = jnp.tanh(gates[:, 2 * H:3 * H])
        o_g = jax.nn.sigmoid(gates[:, 3 * H:4 * H])
        c_new = f_g * c + i_g * g_g
        h_new = o_g * jnp.tanh(c_new)
        return (h_new, c_new)

    h0 = jnp.zeros((B, H), jnp.float32)
    c0 = jnp.zeros((B, H), jnp.float32)
    h_T, _ = lax.fori_loop(0, S, step, (h0, c0), unroll=True)

    # Final projection: h_T @ W_out + b_out (written unconditionally).
    out_ref[...] = (
        jnp.dot(h_T, wout_ref[...], preferred_element_type=jnp.float32)
        + bout_ref[...])


def text_lstm_forward(x_bsv, w_ih, w_hh, b_gates, w_out, b_out):
    """x_bsv: (B, S, V) batch-first, like the PyTorch module's input X."""
    B, S, V = x_bsv.shape
    H = w_hh.shape[0]

    # Pad batch to at least one full sublane tile (8 rows); extra rows are
    # independent and simply discarded at the end.
    B_pad = max(B, 8)
    x_sbv = jnp.transpose(x_bsv, (1, 0, 2))             # (S, B, V) time-major
    if B_pad != B:
        x_sbv = jnp.pad(x_sbv, ((0, 0), (0, B_pad - B), (0, 0)))
    x_flat = x_sbv.reshape(S * B_pad, V)                 # (S*B, V)

    b_gates2 = b_gates.reshape(1, 4 * H)
    b_out2 = b_out.reshape(1, V)

    vmem = pl.BlockSpec(memory_space=pltpu.MemorySpace.VMEM)
    out = pl.pallas_call(
        lstm_kernel,
        out_shape=jax.ShapeDtypeStruct((B_pad, V), jnp.float32),
        in_specs=[vmem] * 6,
        out_specs=vmem,
        scratch_shapes=[pltpu.VMEM((S * B_pad, 4 * H), jnp.float32)],
    )(x_flat, w_ih, w_hh, b_gates2, w_out, b_out2)
    return out[:B]


def text_lstm_reference(x_bsv, w_ih, w_hh, b_gates, w_out, b_out):
    """Pure-JAX reference (lax.scan LSTM) for correctness check."""
    B, S, V = x_bsv.shape
    H = w_hh.shape[0]
    x_sbv = jnp.transpose(x_bsv, (1, 0, 2))

    def step(carry, x_t):
        h, c = carry
        gates = x_t @ w_ih + h @ w_hh + b_gates
        i_g = jax.nn.sigmoid(gates[:, 0:H])
        f_g = jax.nn.sigmoid(gates[:, H:2 * H])
        g_g = jnp.tanh(gates[:, 2 * H:3 * H])
        o_g = jax.nn.sigmoid(gates[:, 3 * H:4 * H])
        c_new = f_g * c + i_g * g_g
        h_new = o_g * jnp.tanh(c_new)
        return (h_new, c_new), h_new

    h0 = jnp.zeros((B, H), jnp.float32)
    c0 = jnp.zeros((B, H), jnp.float32)
    (h_T, _), _ = lax.scan(step, (h0, c0), x_sbv)
    return h_T @ w_out + b_out


if __name__ == "__main__":
    B, S, V, H = 2, 8, VOCAB_SIZE, HIDDEN_SIZE

    key = jax.random.PRNGKey(0)
    k_x, k_wih, k_whh, k_bih, k_bhh, k_w, k_b = jax.random.split(key, 7)

    # Input: one-hot character sequences (batch-first, like PyTorch X)
    ids = jax.random.randint(k_x, (B, S), 0, V)
    x = jax.nn.one_hot(ids, V, dtype=jnp.float32)                 # (B, S, V)

    # Deterministic parameter init (shapes match nn.LSTM + W, b of the module)
    bound = 1.0 / jnp.sqrt(H)
    w_ih = jax.random.uniform(k_wih, (V, 4 * H), jnp.float32, -bound, bound)
    w_hh = jax.random.uniform(k_whh, (H, 4 * H), jnp.float32, -bound, bound)
    b_ih = jax.random.uniform(k_bih, (4 * H,), jnp.float32, -bound, bound)
    b_hh = jax.random.uniform(k_bhh, (4 * H,), jnp.float32, -bound, bound)
    b_gates = b_ih + b_hh
    w_out = jax.random.normal(k_w, (H, V), jnp.float32)           # self.W
    b_out = jax.random.normal(k_b, (V,), jnp.float32)             # self.b

    out = text_lstm_forward(x, w_ih, w_hh, b_gates, w_out, b_out)
    out = jax.block_until_ready(out)

    ref = text_lstm_reference(x, w_ih, w_hh, b_gates, w_out, b_out)
    assert out.shape == (B, V)
    assert jnp.allclose(out, ref, atol=1e-4, rtol=1e-4), "mismatch vs reference"

    print("KERNEL_OK")
</pallas_src>

<mosaic_0001>
module attributes {stable_mosaic.version = 11 : i64} {
  func.func @lstm_kernel(%arg0: memref<64x26xf32, #tpu.memory_space<vmem>>, %arg1: memref<26x512xf32, #tpu.memory_space<vmem>>, %arg2: memref<128x512xf32, #tpu.memory_space<vmem>>, %arg3: memref<1x512xf32, #tpu.memory_space<vmem>>, %arg4: memref<128x26xf32, #tpu.memory_space<vmem>>, %arg5: memref<1x26xf32, #tpu.memory_space<vmem>>, %arg6: memref<8x26xf32, #tpu.memory_space<vmem>>, %arg7: memref<64x512xf32, #tpu.memory_space<vmem>>) attributes {dimension_semantics = [], scalar_prefetch = 0 : i64, scratch_operands = 1 : i64, tpu.core_type = #tpu.core_type<tc>} {
    %c0 = arith.constant 0 : index
    %c0_0 = arith.constant 0 : index
    %0 = vector.load %arg0[%c0, %c0_0] : memref<64x26xf32, #tpu.memory_space<vmem>>, vector<64x26xf32>
    %c0_1 = arith.constant 0 : index
    %c0_2 = arith.constant 0 : index
    %1 = vector.load %arg1[%c0_1, %c0_2] : memref<26x512xf32, #tpu.memory_space<vmem>>, vector<26x512xf32>
    %cst = arith.constant dense<0.000000e+00> : vector<64x512xf32>
    %2 = tpu.matmul %0, %1, %cst {dimension_numbers = #tpu.dot_dimension_numbers<[1], [0], [0], [1], [0, 0, 1, 1], [], []>} : vector<64x26xf32>, vector<26x512xf32>, vector<64x512xf32> -> vector<64x512xf32>
    %c0_3 = arith.constant 0 : index
    %c0_4 = arith.constant 0 : index
    %3 = vector.load %arg3[%c0_3, %c0_4] : memref<1x512xf32, #tpu.memory_space<vmem>>, vector<1x512xf32>
    %4 = vector.broadcast %3 : vector<1x512xf32> to vector<64x512xf32>
    %5 = arith.addf %2, %4 : vector<64x512xf32>
    %c0_5 = arith.constant 0 : index
    %c0_6 = arith.constant 0 : index
    %6 = vector.load %arg7[%c0_5, %c0_6] : memref<64x512xf32, #tpu.memory_space<vmem>>, vector<64x512xf32>
    tpu.vector_store %arg7[%c0_5, %c0_6], %5 {strides = array<i32>} : memref<64x512xf32, #tpu.memory_space<vmem>>, vector<64x512xf32>,
    %c0_7 = arith.constant 0 : index
    %c0_8 = arith.constant 0 : index
    %7 = vector.load %arg2[%c0_7, %c0_8] : memref<128x512xf32, #tpu.memory_space<vmem>>, vector<128x512xf32>
    %cst_9 = arith.constant 0.000000e+00 : f32
    %8 = vector.broadcast %cst_9 : f32 to vector<8x128xf32>
    %cst_10 = arith.constant 0.000000e+00 : f32
    %9 = vector.broadcast %cst_10 : f32 to vector<8x128xf32>
    %c0_i32 = arith.constant 0 : i32
    %c8_i32 = arith.constant 8 : i32
    %10 = arith.muli %c0_i32, %c8_i32 : i32
    %11 = tpu.assume_multiple %10, 8 : i32
    %12 = arith.index_cast %11 : i32 to index
    %c0_11 = arith.constant 0 : index
    %13 = vector.load %arg7[%12, %c0_11] : memref<64x512xf32, #tpu.memory_space<vmem>>, vector<8x512xf32>
    %cst_12 = arith.constant dense<0.000000e+00> : vector<8x512xf32>
    %14 = tpu.matmul %8, %7, %cst_12 {dimension_numbers = #tpu.dot_dimension_numbers<[1], [0], [0], [1], [0, 0, 1, 1], [], []>} : vector<8x128xf32>, vector<128x512xf32>, vector<8x512xf32> -> vector<8x512xf32>
    %15 = arith.addf %13, %14 : vector<8x512xf32>
    %16 = vector.extract_strided_slice %15 {offsets = [0, 0], sizes = [8, 128], strides = [1, 1]} : vector<8x512xf32> to vector<8x128xf32>
    %17 = arith.negf %16 : vector<8x128xf32>
    %18 = math.exp %17 : vector<8x128xf32>
    %cst_13 = arith.constant 1.000000e+00 : f32
    %19 = vector.broadcast %cst_13 : f32 to vector<8x128xf32>
    %20 = arith.addf %19, %18 : vector<8x128xf32>
    %21 = arith.divf %19, %20 : vector<8x128xf32>
    %22 = vector.extract_strided_slice %15 {offsets = [0, 128], sizes = [8, 128], strides = [1, 1]} : vector<8x512xf32> to vector<8x128xf32>
    %23 = arith.negf %22 : vector<8x128xf32>
    %24 = math.exp %23 : vector<8x128xf32>
    %cst_14 = arith.constant 1.000000e+00 : f32
    %25 = vector.broadcast %cst_14 : f32 to vector<8x128xf32>
    %26 = arith.addf %25, %24 : vector<8x128xf32>
    %27 = arith.divf %25, %26 : vector<8x128xf32>
    %28 = vector.extract_strided_slice %15 {offsets = [0, 256], sizes = [8, 128], strides = [1, 1]} : vector<8x512xf32> to vector<8x128xf32>
    %29 = math.tanh %28 : vector<8x128xf32>
    %30 = vector.extract_strided_slice %15 {offsets = [0, 384], sizes = [8, 128], strides = [1, 1]} : vector<8x512xf32> to vector<8x128xf32>
    %31 = arith.negf %30 : vector<8x128xf32>
    %32 = math.exp %31 : vector<8x128xf32>
    %cst_15 = arith.constant 1.000000e+00 : f32
    %33 = vector.broadcast %cst_15 : f32 to vector<8x128xf32>
    %34 = arith.addf %33, %32 : vector<8x128xf32>
    %35 = arith.divf %33, %34 : vector<8x128xf32>
    %36 = arith.mulf %27, %9 : vector<8x128xf32>
    %37 = arith.mulf %21, %29 : vector<8x128xf32>
    %38 = arith.addf %36, %37 : vector<8x128xf32>
    %39 = math.tanh %38 : vector<8x128xf32>
    %40 = arith.mulf %35, %39 : vector<8x128xf32>
    %c1_i32 = arith.constant 1 : i32
    %c8_i32_16 = arith.constant 8 : i32
    %41 = arith.muli %c1_i32, %c8_i32_16 : i32
    %42 = tpu.assume_multiple %41, 8 : i32
    %43 = arith.index_cast %42 : i32 to index
    %c0_17 = arith.constant 0 : index
    %44 = vector.load %arg7[%43, %c0_17] : memref<64x512xf32, #tpu.memory_space<vmem>>, vector<8x512xf32>
    %cst_18 = arith.constant dense<0.000000e+00> : vector<8x512xf32>
    %45 = tpu.matmul %40, %7, %cst_18 {dimension_numbers = #tpu.dot_dimension_numbers<[1], [0], [0], [1], [0, 0, 1, 1], [], []>} : vector<8x128xf32>, vector<128x512xf32>, vector<8x512xf32> -> vector<8x512xf32>
    %46 = arith.addf %44, %45 : vector<8x512xf32>
    %47 = vector.extract_strided_slice %46 {offsets = [0, 0], sizes = [8, 128], strides = [1, 1]} : vector<8x512xf32> to vector<8x128xf32>
    %48 = arith.negf %47 : vector<8x128xf32>
    %49 = math.exp %48 : vector<8x128xf32>
    %cst_19 = arith.constant 1.000000e+00 : f32
    %50 = vector.broadcast %cst_19 : f32 to vector<8x128xf32>
    %51 = arith.addf %50, %49 : vector<8x128xf32>
    %52 = arith.divf %50, %51 : vector<8x128xf32>
    %53 = vector.extract_strided_slice %46 {offsets = [0, 128], sizes = [8, 128], strides = [1, 1]} : vector<8x512xf32> to vector<8x128xf32>
    %54 = arith.negf %53 : vector<8x128xf32>
    %55 = math.exp %54 : vector<8x128xf32>
    %cst_20 = arith.constant 1.000000e+00 : f32
    %56 = vector.broadcast %cst_20 : f32 to vector<8x128xf32>
    %57 = arith.addf %56, %55 : vector<8x128xf32>
    %58 = arith.divf %56, %57 : vector<8x128xf32>
    %59 = vector.extract_strided_slice %46 {offsets = [0, 256], sizes = [8, 128], strides = [1, 1]} : vector<8x512xf32> to vector<8x128xf32>
    %60 = math.tanh %59 : vector<8x128xf32>
    %61 = vector.extract_strided_slice %46 {offsets = [0, 384], sizes = [8, 128], strides = [1, 1]} : vector<8x512xf32> to vector<8x128xf32>
    %62 = arith.negf %61 : vector<8x128xf32>
    %63 = math.exp %62 : vector<8x128xf32>
    %cst_21 = arith.constant 1.000000e+00 : f32
    %64 = vector.broadcast %cst_21 : f32 to vector<8x128xf32>
    %65 = arith.addf %64, %63 : vector<8x128xf32>
    %66 = arith.divf %64, %65 : vector<8x128xf32>
    %67 = arith.mulf %58, %38 : vector<8x128xf32>
    %68 = arith.mulf %52, %60 : vector<8x128xf32>
    %69 = arith.addf %67, %68 : vector<8x128xf32>
    %70 = math.tanh %69 : vector<8x128xf32>
    %71 = arith.mulf %66, %70 : vector<8x128xf32>
    %c2_i32 = arith.constant 2 : i32
    %c8_i32_22 = arith.constant 8 : i32
    %72 = arith.muli %c2_i32, %c8_i32_22 : i32
    %73 = tpu.assume_multiple %72, 8 : i32
    %74 = arith.index_cast %73 : i32 to index
    %c0_23 = arith.constant 0 : index
    %75 = vector.load %arg7[%74, %c0_23] : memref<64x512xf32, #tpu.memory_space<vmem>>, vector<8x512xf32>
    %cst_24 = arith.constant dense<0.000000e+00> : vector<8x512xf32>
    %76 = tpu.matmul %71, %7, %cst_24 {dimension_numbers = #tpu.dot_dimension_numbers<[1], [0], [0], [1], [0, 0, 1, 1], [], []>} : vector<8x128xf32>, vector<128x512xf32>, vector<8x512xf32> -> vector<8x512xf32>
    %77 = arith.addf %75, %76 : vector<8x512xf32>
    %78 = vector.extract_strided_slice %77 {offsets = [0, 0], sizes = [8, 128], strides = [1, 1]} : vector<8x512xf32> to vector<8x128xf32>
    %79 = arith.negf %78 : vector<8x128xf32>
    %80 = math.exp %79 : vector<8x128xf32>
    %cst_25 = arith.constant 1.000000e+00 : f32
    %81 = vector.broadcast %cst_25 : f32 to vector<8x128xf32>
    %82 = arith.addf %81, %80 : vector<8x128xf32>
    %83 = arith.divf %81, %82 : vector<8x128xf32>
    %84 = vector.extract_strided_slice %77 {offsets = [0, 128], sizes = [8, 128], strides = [1, 1]} : vector<8x512xf32> to vector<8x128xf32>
    %85 = arith.negf %84 : vector<8x128xf32>
    %86 = math.exp %85 : vector<8x128xf32>
    %cst_26 = arith.constant 1.000000e+00 : f32
    %87 = vector.broadcast %cst_26 : f32 to vector<8x128xf32>
    %88 = arith.addf %87, %86 : vector<8x128xf32>
    %89 = arith.divf %87, %88 : vector<8x128xf32>
    %90 = vector.extract_strided_slice %77 {offsets = [0, 256], sizes = [8, 128], strides = [1, 1]} : vector<8x512xf32> to vector<8x128xf32>
    %91 = math.tanh %90 : vector<8x128xf32>
    %92 = vector.extract_strided_slice %77 {offsets = [0, 384], sizes = [8, 128], strides = [1, 1]} : vector<8x512xf32> to vector<8x128xf32>
    %93 = arith.negf %92 : vector<8x128xf32>
    %94 = math.exp %93 : vector<8x128xf32>
    %cst_27 = arith.constant 1.000000e+00 : f32
    %95 = vector.broadcast %cst_27 : f32 to vector<8x128xf32>
    %96 = arith.addf %95, %94 : vector<8x128xf32>
    %97 = arith.divf %95, %96 : vector<8x128xf32>
    %98 = arith.mulf %89, %69 : vector<8x128xf32>
    %99 = arith.mulf %83, %91 : vector<8x128xf32>
    %100 = arith.addf %98, %99 : vector<8x128xf32>
    %101 = math.tanh %100 : vector<8x128xf32>
    %102 = arith.mulf %97, %101 : vector<8x128xf32>
    %c3_i32 = arith.constant 3 : i32
    %c8_i32_28 = arith.constant 8 : i32
    %103 = arith.muli %c3_i32, %c8_i32_28 : i32
    %104 = tpu.assume_multiple %103, 8 : i32
    %105 = arith.index_cast %104 : i32 to index
    %c0_29 = arith.constant 0 : index
    %106 = vector.load %arg7[%105, %c0_29] : memref<64x512xf32, #tpu.memory_space<vmem>>, vector<8x512xf32>
    %cst_30 = arith.constant dense<0.000000e+00> : vector<8x512xf32>
    %107 = tpu.matmul %102, %7, %cst_30 {dimension_numbers = #tpu.dot_dimension_numbers<[1], [0], [0], [1], [0, 0, 1, 1], [], []>} : vector<8x128xf32>, vector<128x512xf32>, vector<8x512xf32> -> vector<8x512xf32>
    %108 = arith.addf %106, %107 : vector<8x512xf32>
    %109 = vector.extract_strided_slice %108 {offsets = [0, 0], sizes = [8, 128], strides = [1, 1]} : vector<8x512xf32> to vector<8x128xf32>
    %110 = arith.negf %109 : vector<8x128xf32>
    %111 = math.exp %110 : vector<8x128xf32>
    %cst_31 = arith.constant 1.000000e+00 : f32
    %112 = vector.broadcast %cst_31 : f32 to vector<8x128xf32>
    %113 = arith.addf %112, %111 : vector<8x128xf32>
    %114 = arith.divf %112, %113 : vector<8x128xf32>
    %115 = vector.extract_strided_slice %108 {offsets = [0, 128], sizes = [8, 128], strides = [1, 1]} : vector<8x512xf32> to vector<8x128xf32>
    %116 = arith.negf %115 : vector<8x128xf32>
    %117 = math.exp %116 : vector<8x128xf32>
    %cst_32 = arith.constant 1.000000e+00 : f32
    %118 = vector.broadcast %cst_32 : f32 to vector<8x128xf32>
    %119 = arith.addf %118, %117 : vector<8x128xf32>
    %120 = arith.divf %118, %119 : vector<8x128xf32>
    %121 = vector.extract_strided_slice %108 {offsets = [0, 256], sizes = [8, 128], strides = [1, 1]} : vector<8x512xf32> to vector<8x128xf32>
    %122 = math.tanh %121 : vector<8x128xf32>
    %123 = vector.extract_strided_slice %108 {offsets = [0, 384], sizes = [8, 128], strides = [1, 1]} : vector<8x512xf32> to vector<8x128xf32>
    %124 = arith.negf %123 : vector<8x128xf32>
    %125 = math.exp %124 : vector<8x128xf32>
    %cst_33 = arith.constant 1.000000e+00 : f32
    %126 = vector.broadcast %cst_33 : f32 to vector<8x128xf32>
    %127 = arith.addf %126, %125 : vector<8x128xf32>
    %128 = arith.divf %126, %127 : vector<8x128xf32>
    %129 = arith.mulf %120, %100 : vector<8x128xf32>
    %130 = arith.mulf %114, %122 : vector<8x128xf32>
    %131 = arith.addf %129, %130 : vector<8x128xf32>
    %132 = math.tanh %131 : vector<8x128xf32>
    %133 = arith.mulf %128, %132 : vector<8x128xf32>
    %c4_i32 = arith.constant 4 : i32
    %c8_i32_34 = arith.constant 8 : i32
    %134 = arith.muli %c4_i32, %c8_i32_34 : i32
    %135 = tpu.assume_multiple %134, 8 : i32
    %136 = arith.index_cast %135 : i32 to index
    %c0_35 = arith.constant 0 : index
    %137 = vector.load %arg7[%136, %c0_35] : memref<64x512xf32, #tpu.memory_space<vmem>>, vector<8x512xf32>
    %cst_36 = arith.constant dense<0.000000e+00> : vector<8x512xf32>
    %138 = tpu.matmul %133, %7, %cst_36 {dimension_numbers = #tpu.dot_dimension_numbers<[1], [0], [0], [1], [0, 0, 1, 1], [], []>} : vector<8x128xf32>, vector<128x512xf32>, vector<8x512xf32> -> vector<8x512xf32>
    %139 = arith.addf %137, %138 : vector<8x512xf32>
    %140 = vector.extract_strided_slice %139 {offsets = [0, 0], sizes = [8, 128], strides = [1, 1]} : vector<8x512xf32> to vector<8x128xf32>
    %141 = arith.negf %140 : vector<8x128xf32>
    %142 = math.exp %141 : vector<8x128xf32>
    %cst_37 = arith.constant 1.000000e+00 : f32
    %143 = vector.broadcast %cst_37 : f32 to vector<8x128xf32>
    %144 = arith.addf %143, %142 : vector<8x128xf32>
    %145 = arith.divf %143, %144 : vector<8x128xf32>
    %146 = vector.extract_strided_slice %139 {offsets = [0, 128], sizes = [8, 128], strides = [1, 1]} : vector<8x512xf32> to vector<8x128xf32>
    %147 = arith.negf %146 : vector<8x128xf32>
    %148 = math.exp %147 : vector<8x128xf32>
    %cst_38 = arith.constant 1.000000e+00 : f32
    %149 = vector.broadcast %cst_38 : f32 to vector<8x128xf32>
    %150 = arith.addf %149, %148 : vector<8x128xf32>
    %151 = arith.divf %149, %150 : vector<8x128xf32>
    %152 = vector.extract_strided_slice %139 {offsets = [0, 256], sizes = [8, 128], strides = [1, 1]} : vector<8x512xf32> to vector<8x128xf32>
    %153 = math.tanh %152 : vector<8x128xf32>
    %154 = vector.extract_strided_slice %139 {offsets = [0, 384], sizes = [8, 128], strides = [1, 1]} : vector<8x512xf32> to vector<8x128xf32>
    %155 = arith.negf %154 : vector<8x128xf32>
    %156 = math.exp %155 : vector<8x128xf32>
    %cst_39 = arith.constant 1.000000e+00 : f32
    %157 = vector.broadcast %cst_39 : f32 to vector<8x128xf32>
    %158 = arith.addf %157, %156 : vector<8x128xf32>
    %159 = arith.divf %157, %158 : vector<8x128xf32>
    %160 = arith.mulf %151, %131 : vector<8x128xf32>
    %161 = arith.mulf %145, %153 : vector<8x128xf32>
    %162 = arith.addf %160, %161 : vector<8x128xf32>
    %163 = math.tanh %162 : vector<8x128xf32>
    %164 = arith.mulf %159, %163 : vector<8x128xf32>
    %c5_i32 = arith.constant 5 : i32
    %c8_i32_40 = arith.constant 8 : i32
    %165 = arith.muli %c5_i32, %c8_i32_40 : i32
    %166 = tpu.assume_multiple %165, 8 : i32
    %167 = arith.index_cast %166 : i32 to index
    %c0_41 = arith.constant 0 : index
    %168 = vector.load %arg7[%167, %c0_41] : memref<64x512xf32, #tpu.memory_space<vmem>>, vector<8x512xf32>
    %cst_42 = arith.constant dense<0.000000e+00> : vector<8x512xf32>
    %169 = tpu.matmul %164, %7, %cst_42 {dimension_numbers = #tpu.dot_dimension_numbers<[1], [0], [0], [1], [0, 0, 1, 1], [], []>} : vector<8x128xf32>, vector<128x512xf32>, vector<8x512xf32> -> vector<8x512xf32>
    %170 = arith.addf %168, %169 : vector<8x512xf32>
    %171 = vector.extract_strided_slice %170 {offsets = [0, 0], sizes = [8, 128], strides = [1, 1]} : vector<8x512xf32> to vector<8x128xf32>
    %172 = arith.negf %171 : vector<8x128xf32>
    %173 = math.exp %172 : vector<8x128xf32>
    %cst_43 = arith.constant 1.000000e+00 : f32
    %174 = vector.broadcast %cst_43 : f32 to vector<8x128xf32>
    %175 = arith.addf %174, %173 : vector<8x128xf32>
    %176 = arith.divf %174, %175 : vector<8x128xf32>
    %177 = vector.extract_strided_slice %170 {offsets = [0, 128], sizes = [8, 128], strides = [1, 1]} : vector<8x512xf32> to vector<8x128xf32>
    %178 = arith.negf %177 : vector<8x128xf32>
    %179 = math.exp %178 : vector<8x128xf32>
    %cst_44 = arith.constant 1.000000e+00 : f32
    %180 = vector.broadcast %cst_44 : f32 to vector<8x128xf32>
    %181 = arith.addf %180, %179 : vector<8x128xf32>
    %182 = arith.divf %180, %181 : vector<8x128xf32>
    %183 = vector.extract_strided_slice %170 {offsets = [0, 256], sizes = [8, 128], strides = [1, 1]} : vector<8x512xf32> to vector<8x128xf32>
    %184 = math.tanh %183 : vector<8x128xf32>
    %185 = vector.extract_strided_slice %170 {offsets = [0, 384], sizes = [8, 128], strides = [1, 1]} : vector<8x512xf32> to vector<8x128xf32>
    %186 = arith.negf %185 : vector<8x128xf32>
    %187 = math.exp %186 : vector<8x128xf32>
    %cst_45 = arith.constant 1.000000e+00 : f32
    %188 = vector.broadcast %cst_45 : f32 to vector<8x128xf32>
    %189 = arith.addf %188, %187 : vector<8x128xf32>
    %190 = arith.divf %188, %189 : vector<8x128xf32>
    %191 = arith.mulf %182, %162 : vector<8x128xf32>
    %192 = arith.mulf %176, %184 : vector<8x128xf32>
    %193 = arith.addf %191, %192 : vector<8x128xf32>
    %194 = math.tanh %193 : vector<8x128xf32>
    %195 = arith.mulf %190, %194 : vector<8x128xf32>
    %c6_i32 = arith.constant 6 : i32
    %c8_i32_46 = arith.constant 8 : i32
    %196 = arith.muli %c6_i32, %c8_i32_46 : i32
    %197 = tpu.assume_multiple %196, 8 : i32
    %198 = arith.index_cast %197 : i32 to index
    %c0_47 = arith.constant 0 : index
    %199 = vector.load %arg7[%198, %c0_47] : memref<64x512xf32, #tpu.memory_space<vmem>>, vector<8x512xf32>
    %cst_48 = arith.constant dense<0.000000e+00> : vector<8x512xf32>
    %200 = tpu.matmul %195, %7, %cst_48 {dimension_numbers = #tpu.dot_dimension_numbers<[1], [0], [0], [1], [0, 0, 1, 1], [], []>} : vector<8x128xf32>, vector<128x512xf32>, vector<8x512xf32> -> vector<8x512xf32>
    %201 = arith.addf %199, %200 : vector<8x512xf32>
    %202 = vector.extract_strided_slice %201 {offsets = [0, 0], sizes = [8, 128], strides = [1, 1]} : vector<8x512xf32> to vector<8x128xf32>
    %203 = arith.negf %202 : vector<8x128xf32>
    %204 = math.exp %203 : vector<8x128xf32>
    %cst_49 = arith.constant 1.000000e+00 : f32
    %205 = vector.broadcast %cst_49 : f32 to vector<8x128xf32>
    %206 = arith.addf %205, %204 : vector<8x128xf32>
    %207 = arith.divf %205, %206 : vector<8x128xf32>
    %208 = vector.extract_strided_slice %201 {offsets = [0, 128], sizes = [8, 128], strides = [1, 1]} : vector<8x512xf32> to vector<8x128xf32>
    %209 = arith.negf %208 : vector<8x128xf32>
    %210 = math.exp %209 : vector<8x128xf32>
    %cst_50 = arith.constant 1.000000e+00 : f32
    %211 = vector.broadcast %cst_50 : f32 to vector<8x128xf32>
    %212 = arith.addf %211, %210 : vector<8x128xf32>
    %213 = arith.divf %211, %212 : vector<8x128xf32>
    %214 = vector.extract_strided_slice %201 {offsets = [0, 256], sizes = [8, 128], strides = [1, 1]} : vector<8x512xf32> to vector<8x128xf32>
    %215 = math.tanh %214 : vector<8x128xf32>
    %216 = vector.extract_strided_slice %201 {offsets = [0, 384], sizes = [8, 128], strides = [1, 1]} : vector<8x512xf32> to vector<8x128xf32>
    %217 = arith.negf %216 : vector<8x128xf32>
    %218 = math.exp %217 : vector<8x128xf32>
    %cst_51 = arith.constant 1.000000e+00 : f32
    %219 = vector.broadcast %cst_51 : f32 to vector<8x128xf32>
    %220 = arith.addf %219, %218 : vector<8x128xf32>
    %221 = arith.divf %219, %220 : vector<8x128xf32>
    %222 = arith.mulf %213, %193 : vector<8x128xf32>
    %223 = arith.mulf %207, %215 : vector<8x128xf32>
    %224 = arith.addf %222, %223 : vector<8x128xf32>
    %225 = math.tanh %224 : vector<8x128xf32>
    %226 = arith.mulf %221, %225 : vector<8x128xf32>
    %c7_i32 = arith.constant 7 : i32
    %c8_i32_52 = arith.constant 8 : i32
    %227 = arith.muli %c7_i32, %c8_i32_52 : i32
    %228 = tpu.assume_multiple %227, 8 : i32
    %229 = arith.index_cast %228 : i32 to index
    %c0_53 = arith.constant 0 : index
    %230 = vector.load %arg7[%229, %c0_53] : memref<64x512xf32, #tpu.memory_space<vmem>>, vector<8x512xf32>
    %cst_54 = arith.constant dense<0.000000e+00> : vector<8x512xf32>
    %231 = tpu.matmul %226, %7, %cst_54 {dimension_numbers = #tpu.dot_dimension_numbers<[1], [0], [0], [1], [0, 0, 1, 1], [], []>} : vector<8x128xf32>, vector<128x512xf32>, vector<8x512xf32> -> vector<8x512xf32>
    %232 = arith.addf %230, %231 : vector<8x512xf32>
    %233 = vector.extract_strided_slice %232 {offsets = [0, 0], sizes = [8, 128], strides = [1, 1]} : vector<8x512xf32> to vector<8x128xf32>
    %234 = arith.negf %233 : vector<8x128xf32>
    %235 = math.exp %234 : vector<8x128xf32>
    %cst_55 = arith.constant 1.000000e+00 : f32
    %236 = vector.broadcast %cst_55 : f32 to vector<8x128xf32>
    %237 = arith.addf %236, %235 : vector<8x128xf32>
    %238 = arith.divf %236, %237 : vector<8x128xf32>
    %239 = vector.extract_strided_slice %232 {offsets = [0, 128], sizes = [8, 128], strides = [1, 1]} : vector<8x512xf32> to vector<8x128xf32>
    %240 = arith.negf %239 : vector<8x128xf32>
    %241 = math.exp %240 : vector<8x128xf32>
    %cst_56 = arith.constant 1.000000e+00 : f32
    %242 = vector.broadcast %cst_56 : f32 to vector<8x128xf32>
    %243 = arith.addf %242, %241 : vector<8x128xf32>
    %244 = arith.divf %242, %243 : vector<8x128xf32>
    %245 = vector.extract_strided_slice %232 {offsets = [0, 256], sizes = [8, 128], strides = [1, 1]} : vector<8x512xf32> to vector<8x128xf32>
    %246 = math.tanh %245 : vector<8x128xf32>
    %247 = vector.extract_strided_slice %232 {offsets = [0, 384], sizes = [8, 128], strides = [1, 1]} : vector<8x512xf32> to vector<8x128xf32>
    %248 = arith.negf %247 : vector<8x128xf32>
    %249 = math.exp %248 : vector<8x128xf32>
    %cst_57 = arith.constant 1.000000e+00 : f32
    %250 = vector.broadcast %cst_57 : f32 to vector<8x128xf32>
    %251 = arith.addf %250, %249 : vector<8x128xf32>
    %252 = arith.divf %250, %251 : vector<8x128xf32>
    %253 = arith.mulf %244, %224 : vector<8x128xf32>
    %254 = arith.mulf %238, %246 : vector<8x128xf32>
    %255 = arith.addf %253, %254 : vector<8x128xf32>
    %256 = math.tanh %255 : vector<8x128xf32>
    %257 = arith.mulf %252, %256 : vector<8x128xf32>
    %c8_i32_58 = arith.constant 8 : i32
    %c0_59 = arith.constant 0 : index
    %c0_60 = arith.constant 0 : index
    %258 = vector.load %arg4[%c0_59, %c0_60] : memref<128x26xf32, #tpu.memory_space<vmem>>, vector<128x26xf32>
    %cst_61 = arith.constant dense<0.000000e+00> : vector<8x26xf32>
    %259 = tpu.matmul %257, %258, %cst_61 {dimension_numbers = #tpu.dot_dimension_numbers<[1], [0], [0], [1], [0, 0, 1, 1], [], []>} : vector<8x128xf32>, vector<128x26xf32>, vector<8x26xf32> -> vector<8x26xf32>
    %c0_62 = arith.constant 0 : index
    %c0_63 = arith.constant 0 : index
    %260 = vector.load %arg5[%c0_62, %c0_63] : memref<1x26xf32, #tpu.memory_space<vmem>>, vector<1x26xf32>
    %261 = vector.broadcast %260 : vector<1x26xf32> to vector<8x26xf32>
    %262 = arith.addf %259, %261 : vector<8x26xf32>
    %c0_64 = arith.constant 0 : index
    %c0_65 = arith.constant 0 : index
    %263 = vector.load %arg6[%c0_64, %c0_65] : memref<8x26xf32, #tpu.memory_space<vmem>>, vector<8x26xf32>
    tpu.vector_store %arg6[%c0_64, %c0_65], %262 {strides = array<i32>} : memref<8x26xf32, #tpu.memory_space<vmem>>, vector<8x26xf32>,
    return
  }
}

</mosaic_0001>

<bundles_post_ra>
// kernel: tpu_custom_call.1
= control target key start
LH: loop header
LB: loop body
LE: loop exit
PB: predicated region body
PF: predicated region fallthrough
CT: control target
= control target key end

     0   :  { %11 = vsyncpa [#allocation4], 0  ;;  %s3522_s0 = inlined_call_operand.vmem [shape: f32[64,26], index: 0, kind: input, shape index: {}]   ;;  %s3523_s1 = inlined_call_operand.vmem [shape: f32[26,512], index: 1, kind: input, shape index: {}]   ;;  %s3524_s2 = inlined_call_operand.hbm [shape: f32[128,512], index: 2, kind: input, shape index: {}]   ;;  %s3525_s3 = inlined_call_operand.vmem [shape: f32[1,512], index: 3, kind: input, shape index: {}]   ;;  %s3526_s4 = inlined_call_operand.vmem [shape: f32[128,26], index: 4, kind: input, shape index: {}]   ;;  %s3527_s5 = inlined_call_operand.vmem [shape: f32[1,26], index: 5, kind: input, shape index: {}]   ;;  %s3528_s6 = inlined_call_operand.hbm [shape: f32[8,26], index: 6, kind: output, shape index: {}]  }
   0x1   :  { %12 = vsyncpa [#allocation5], 0  ;;  %s2877_s21 = smov [#allocation3]   ;;  %s2829_s25 = scalar_lea.hbm %s3524_s2, 8192 }
   0x2   :  { %s22_s22 = sshll.u32 %s2877_s21, 4  ;;  %p2830_p0 = scmp.ne.s32.totalorder %s3524_s2, %s2829_s25  ;;  %s23_s22 = int_to_ptr.vmem [resolvable:$true] %s22_s22 }
   0x3   :  { %p2833_p1 = scmp.lt.u32.totalorder %s2829_s25, %s3524_s2 }
   0x5   :  { %p2835_p2 = pnand %p2833_p1, %p2830_p0 }
   0x7   :  { %2838 = shalt.err (!%p2835_p2)
}
   0x8   :  { %s2839_s30 = scalar_lea.vmem %s23_s22, 8192  ;;  %p2844_p4 = scmp.lt.s32.totalorder %s23_s22, %s23_s22 }
   0x9   :  { %p2840_p3 = scmp.ne.s32.totalorder %s23_s22, %s2839_s30  ;;  %p2845_p5 = scmp.lt.s32.totalorder %s2839_s30, %s2839_s30 }
   0xb   :  { %p2846_p6 = por %p2845_p5, %p2844_p4 }
   0xd   :  { %p2847_p7 = pnand %p2846_p6, %p2840_p3 }
   0xf   :  { %2850 = shalt.err (!%p2847_p7)
}
  0x10   :  { %s2878_s7 = smov 512   ;;  %s2879_s8 = smov 32  }
  0x11   :  { %28 = dma.hbm_to_vmem [thread:$0]  %s3524_s2, 8192, %s23_s22, [#allocation4], %s2878_s7, %s2878_s7, %s2879_s8  }
  0x12   :  { %2873 = dma.done.wait [#allocation4], 8192  }
  0x13   :  { %2874 = vsyncadd [#allocation4], 4294959104  ;;  %v2880_v0 = vmov 0.0   ;;  %vm109_vm0 = vcmask 1041408   ;;  %vm2881_vm1 = vmmov 1   ;;  %v47_v2 = vld [vmem:[%s3523_s1 + $0x8] sm:$0xff] }
  0x14   :  { %186 = vmatprep.mubr.f32.mxu0 %v2880_v0  ;;  %299 = vmatprep.mubr.f32.mxu1 %v2880_v0  ;;  %vm2934_vm2 = vmpackc.low %vm109_vm0, %vm2881_vm1  ;;  %v51_v3 = vld [vmem:[%s3523_s1 + $0x28] sm:$0xff]  ;;  %v49_v4 = vld [vmem:[%s3523_s1 + $0x18] sm:$0xff]  ;;  %vm84_vm3 = vcmask 211968   ;;  %vm2883_vm4 = vmmov 0   ;;  %s2884_s13 = smov [#allocation6]  }
  0x15   :  { %v2073_v5 = vpack.c.bf16 %v51_v3, %v47_v2  ;;  %v53_v6 = vld [vmem:[%s3523_s1 + $0x38] sm:$0xff]  ;;  %v46_v7 = vld [vmem:[%s3523_s1] sm:$0xff]  ;;  %v48_v11 = vld [vmem:[%s3523_s1 + $0x10] sm:$0xff]  ;;  %s1960_s14 = sshll.u32 %s2884_s13, 4  ;;  %s1961_s14 = int_to_ptr.vmem [resolvable:$true] %s1960_s14 }
  0x16   :  { %v50_v8 = vld [vmem:[%s3523_s1 + $0x20] sm:$0xff]  ;;  %v2083_v9 = vpack.c.bf16 %v53_v6, %v49_v4  ;;  %v52_v12 = vld [vmem:[%s3523_s1 + $0x30] sm:$0xff]  ;;  %v55_v13 = vld [vmem:[%s3523_s1 + $0x48] sm:$0xff]  ;;  %s2851_s2 = scalar_lea.vmem %s1961_s14, 128  ;;  %p2856_p9 = scmp.lt.s32.totalorder %s1961_s14, %s1961_s14 }
  0x17   :  { %v2075_v10 = vpack.c.bf16 %v50_v8, %v46_v7  ;;  %2074 = vmatprep.subr.bf16.mxu0 %v2073_v5  ;;  %v2085_v14 = vpack.c.bf16 %v52_v12, %v48_v11  ;;  %v59_v15 = vld [vmem:[%s3523_s1 + $0x68] sm:$0x3]  ;;  %v57_v16 = vld [vmem:[%s3523_s1 + $0x58] sm:$0xff]  ;;  %v54_v20 = vld [vmem:[%s3523_s1 + $0x40] sm:$0xff]  ;;  %p2852_p8 = scmp.ne.s32.totalorder %s1961_s14, %s2851_s2  ;;  %p2857_p10 = scmp.lt.s32.totalorder %s2851_s2, %s2851_s2 }
  0x18   :  { %v61_v17 = vld [vmem:[%s3523_s1 + $0x78] sm:$0x3]  ;;  %2084 = vmatprep.subr.bf16.mxu1 %v2083_v9  ;;  %v2077_v18 = vpack.c.bf16 %v59_v15, %v55_v13  ;;  %v58_v21 = vld [vmem:[%s3523_s1 + $0x60] sm:$0x3]  ;;  %v56_v22 = vld [vmem:[%s3523_s1 + $0x50] sm:$0xff] }
  0x19   :  { %2076 = vmatpush1.bf16.msra.mxu0 %v2075_v10  ;;  %v2087_v19 = vpack.c.bf16 %v61_v17, %v57_v16  ;;  %2086 = vmatpush1.bf16.msra.mxu1 %v2085_v14  ;;  %v2080_v23 = vpack.c.bf16 %v58_v21, %v54_v20  ;;  %v60_v24 = vld [vmem:[%s3523_s1 + $0x70] sm:$0x3]  ;;  %v381_v25 = vld [vmem:[#allocation3 + $0x8] sm:$0xff]  ;;  %v383_v28 = vld [vmem:[#allocation3 + $0x18] sm:$0xff]  ;;  %p2858_p11 = por %p2857_p10, %p2856_p9 }
  0x1a   :  { %2079 = vmatprep.subr.msk.bf16.mxu0 %vm2934_vm2, %v2077_v18  ;;  %v2090_v26 = vpack.c.bf16 %v60_v24, %v56_v22  ;;  %v385_v27 = vld [vmem:[#allocation3 + $0x28] sm:$0xff]  ;;  %v387_v29 = vld [vmem:[#allocation3 + $0x38] sm:$0xff]  ;;  %v380_v32 = vld [vmem:[#allocation3] sm:$0xff] }
  0x1b   :  { %2089 = vmatprep.subr.msk.bf16.mxu1 %vm2934_vm2, %v2087_v19  ;;  %v2990_v30 = vpack.c.bf16 %v385_v27, %v381_v25  ;;  %v2992_v31 = vpack.c.bf16 %v387_v29, %v383_v28  ;;  %v384_v33 = vld [vmem:[#allocation3 + $0x20] sm:$0xff]  ;;  %v382_v34 = vld [vmem:[#allocation3 + $0x10] sm:$0xff]  ;;  %v389_v38 = vld [vmem:[#allocation3 + $0x48] sm:$0xff]  ;;  %p2859_p12 = pnand %p2858_p11, %p2852_p8 }
  0x1c   :  { %v38_v35 = vld [vmem:[%s3522_s0] sm:$0xff]  ;;  %v2999_v36 = vpack.c.bf16 %v384_v33, %v380_v32  ;;  %v386_v37 = vld [vmem:[#allocation3 + $0x30] sm:$0xff]  ;;  %v393_v40 = vld [vmem:[#allocation3 + $0x68] sm:$0xff] }
  0x1d   :  { %2082 = vmatpush1.bf16.msk.msra.mxu0 %vm2934_vm2, %v2080_v23  ;;  %2092 = vmatpush1.bf16.msk.msra.mxu1 %vm2934_vm2, %v2090_v26  ;;  %v3004_v39 = vpack.c.bf16 %v386_v37, %v382_v34  ;;  %v391_v41 = vld [vmem:[#allocation3 + $0x58] sm:$0xff]  ;;  %v3007_v43 = vpack.c.bf16 %v393_v40, %v389_v38  ;;  %v388_v44 = vld [vmem:[#allocation3 + $0x40] sm:$0xff]  ;;  %v390_v46 = vld [vmem:[#allocation3 + $0x50] sm:$0xff] }
  0x1e   :  { %2094 = vmatprep.subr.bf16.mxu0 %v2990_v30  ;;  %v395_v42 = vld [vmem:[#allocation3 + $0x78] sm:$0xff]  ;;  %2126 = vmatprep.subr.bf16.mxu1 %v2992_v31  ;;  %v392_v45 = vld [vmem:[#allocation3 + $0x60] sm:$0xff]  ;;  %v39_v47 = vld [vmem:[%s3522_s0 + $0x8] sm:$0xff] }
  0x1f   :  { %v3013_v48 = vpack.c.bf16 %v395_v42, %v391_v41  ;;  %v394_v49 = vld [vmem:[#allocation3 + $0x70] sm:$0xff]  ;;  %v397_v50 = vld [vmem:[#allocation3 + $0x88] sm:$0xff]  ;;  %v3017_v51 = vpack.c.bf16 %v392_v45, %v388_v44  ;;  %v399_v53 = vld [vmem:[#allocation3 + $0x98] sm:$0xff] }
  0x20   :  { %1978 = vmatmul.mubr.msk.f32.vlgmr.msra.gmra.mrb[0].mxu0 %vm84_vm3, %v38_v35  ;;  %1988 = vmatmul.mubr.msk.f32.vlgmr.msra.gmra.mrb[0].mxu1 %vm84_vm3, %v38_v35  ;;  %v401_v52 = vld [vmem:[#allocation3 + $0xa8] sm:$0xff]  ;;  %v403_v54 = vld [vmem:[#allocation3 + $0xb8] sm:$0xff]  ;;  %v3021_v55 = vpack.c.bf16 %v394_v49, %v390_v46  ;;  %v396_v56 = vld [vmem:[#allocation3 + $0x80] sm:$0xff] }
  0x21   :  { %2096 = vmatpush1.bf16.msra.mxu0 %v2999_v36  ;;  %2128 = vmatpush1.bf16.msra.mxu1 %v3004_v39  ;;  %v400_v57 = vld [vmem:[#allocation3 + $0xa0] sm:$0xff]  ;;  %v3025_v58 = vpack.c.bf16 %v401_v52, %v397_v50  ;;  %v398_v59 = vld [vmem:[#allocation3 + $0x90] sm:$0xff]  ;;  %v3029_v61 = vpack.c.bf16 %v403_v54, %v399_v53  ;;  %v405_v62 = vld [vmem:[#allocation3 + $0xc8] sm:$0xff] }
  0x22   :  { %192 = vmatprep.mubr.f32.mxu0 %v2880_v0  ;;  %305 = vmatprep.mubr.f32.mxu1 %v2880_v0  ;;  %v402_v60 = vld [vmem:[#allocation3 + $0xb0] sm:$0xff]  ;;  %v409_v63 = vld [vmem:[#allocation3 + $0xe8] sm:$0xff]  ;;  %v3036_v2 = vpack.c.bf16 %v400_v57, %v396_v56  ;;  %v407_v3 = vld [vmem:[#allocation3 + $0xd8] sm:$0xff] }
  0x23   :  { %2098 = vmatprep.subr.bf16.mxu0 %v3007_v43  ;;  %2130 = vmatprep.subr.bf16.mxu1 %v3013_v48  ;;  %v40_v1 = vld [vmem:[%s3522_s0 + $0x10] sm:$0xff]  ;;  %v411_v4 = vld [vmem:[#allocation3 + $0xf8] sm:$0xff]  ;;  %v3040_v5 = vpack.c.bf16 %v402_v60, %v398_v59  ;;  %v404_v6 = vld [vmem:[#allocation3 + $0xc0] sm:$0xff]  ;;  %v3044_v8 = vpack.c.bf16 %v409_v63, %v405_v62 }
  0x24   :  { %1979 = vmatmul.mubr.msk.f32.gmra.mrb[2].mxu0 %vm84_vm3, %v39_v47  ;;  %1989 = vmatmul.mubr.msk.f32.gmra.mrb[2].mxu1 %vm84_vm3, %v39_v47  ;;  %v408_v7 = vld [vmem:[#allocation3 + $0xe0] sm:$0xff]  ;;  %v406_v9 = vld [vmem:[#allocation3 + $0xd0] sm:$0xff]  ;;  %v3048_v11 = vpack.c.bf16 %v411_v4, %v407_v3  ;;  %v413_v12 = vld [vmem:[#allocation3 + $0x108] sm:$0xff] }
  0x25   :  { %2100 = vmatpush1.bf16.msra.mxu0 %v3017_v51  ;;  %2132 = vmatpush1.bf16.msra.mxu1 %v3021_v55  ;;  %v410_v10 = vld [vmem:[#allocation3 + $0xf0] sm:$0xff]  ;;  %v417_v13 = vld [vmem:[#allocation3 + $0x128] sm:$0xff]  ;;  %v41_v14 = vld [vmem:[%s3522_s0 + $0x18] sm:$0xff]  ;;  %v3055_v15 = vpack.c.bf16 %v408_v7, %v404_v6 }
  0x26   :  { %198 = vmatprep.mubr.f32.mxu0 %v2880_v0  ;;  %311 = vmatprep.mubr.f32.mxu1 %v2880_v0  ;;  %v415_v16 = vld [vmem:[#allocation3 + $0x118] sm:$0xff]  ;;  %v3059_v18 = vpack.c.bf16 %v410_v10, %v406_v9  ;;  %v412_v19 = vld [vmem:[#allocation3 + $0x100] sm:$0xff]  ;;  %v3063_v21 = vpack.c.bf16 %v417_v13, %v413_v12  ;;  %v414_v22 = vld [vmem:[#allocation3 + $0x110] sm:$0xff] }
  0x27   :  { %2102 = vmatprep.subr.bf16.mxu0 %v3025_v58  ;;  %2134 = vmatprep.subr.bf16.mxu1 %v3029_v61  ;;  %v419_v17 = vld [vmem:[#allocation3 + $0x138] sm:$0xff]  ;;  %v416_v20 = vld [vmem:[#allocation3 + $0x120] sm:$0xff]  ;;  %v418_v23 = vld [vmem:[#allocation3 + $0x130] sm:$0xff] }
  0x28   :  { %1980 = vmatmul.mubr.msk.f32.gmra.mrb[4].mxu0 %vm84_vm3, %v40_v1  ;;  %1990 = vmatmul.mubr.msk.f32.gmra.mrb[4].mxu1 %vm84_vm3, %v40_v1  ;;  %v3067_v24 = vpack.c.bf16 %v419_v17, %v415_v16  ;;  %v421_v25 = vld [vmem:[#allocation3 + $0x148] sm:$0xff]  ;;  %v42_v27 = vld [vmem:[%s3522_s0 + $0x20] sm:$0xff]  ;;  %v3074_v28 = vpack.c.bf16 %v416_v20, %v412_v19  ;;  %v423_v29 = vld [vmem:[#allocation3 + $0x158] sm:$0xff]  ;;  %v3078_v33 = vpack.c.bf16 %v418_v23, %v414_v22  ;;  %v64_v20 = vlaneseq }
  0x29   :  { %2104 = vmatpush1.bf16.msra.mxu0 %v3036_v2  ;;  %2136 = vmatpush1.bf16.msra.mxu1 %v3040_v5  ;;  %v425_v26 = vld [vmem:[#allocation3 + $0x168] sm:$0xff]  ;;  %v427_v32 = vld [vmem:[#allocation3 + $0x178] sm:$0xff]  ;;  %v420_v34 = vld [vmem:[#allocation3 + $0x140] sm:$0xff] }
  0x2a   :  { %204 = vmatprep.mubr.f32.mxu0 %v2880_v0  ;;  %317 = vmatprep.mubr.f32.mxu1 %v2880_v0  ;;  %v424_v35 = vld [vmem:[#allocation3 + $0x160] sm:$0xff]  ;;  %v3082_v37 = vpack.c.bf16 %v425_v26, %v421_v25  ;;  %v422_v38 = vld [vmem:[#allocation3 + $0x150] sm:$0xff]  ;;  %v3086_v41 = vpack.c.bf16 %v427_v32, %v423_v29  ;;  %v429_v42 = vld [vmem:[#allocation3 + $0x188] sm:$0xff]  ;;  %v65_v22 = vshrl.u32 %v64_v20, 7 }
  0x2b   :  { %2106 = vmatprep.subr.bf16.mxu0 %v3044_v8  ;;  %2138 = vmatprep.subr.bf16.mxu1 %v3048_v11  ;;  %v426_v40 = vld [vmem:[#allocation3 + $0x170] sm:$0xff]  ;;  %v433_v44 = vld [vmem:[#allocation3 + $0x1a8] sm:$0xff]  ;;  %v3093_v46 = vpack.c.bf16 %v424_v35, %v420_v34  ;;  %v431_v47 = vld [vmem:[#allocation3 + $0x198] sm:$0xff] }
  0x2c   :  { %1981 = vmatmul.mubr.msk.f32.gmra.mrb[6].mxu0 %vm84_vm3, %v41_v14  ;;  %1991 = vmatmul.mubr.msk.f32.gmra.mrb[6].mxu1 %vm84_vm3, %v41_v14  ;;  %v43_v45 = vld [vmem:[%s3522_s0 + $0x28] sm:$0xff]  ;;  %v435_v49 = vld [vmem:[#allocation3 + $0x1b8] sm:$0xff]  ;;  %v3097_v50 = vpack.c.bf16 %v426_v40, %v422_v38  ;;  %v428_v52 = vld [vmem:[#allocation3 + $0x180] sm:$0xff]  ;;  %v3101_v54 = vpack.c.bf16 %v433_v44, %v429_v42  ;;  %v66_v23 = vsub.s32 0, %v65_v22  ;;  %v70_v26 = vsub.s32 1, %v65_v22 }
  0x2d   :  { %2108 = vmatpush1.bf16.msra.mxu0 %v3055_v15  ;;  %2140 = vmatpush1.bf16.msra.mxu1 %v3059_v18  ;;  %v432_v53 = vld [vmem:[#allocation3 + $0x1a0] sm:$0xff]  ;;  %v430_v56 = vld [vmem:[#allocation3 + $0x190] sm:$0xff]  ;;  %v3105_v59 = vpack.c.bf16 %v435_v49, %v431_v47  ;;  %v437_v60 = vld [vmem:[#allocation3 + $0x1c8] sm:$0xff]  ;;  %v78_v34 = vsub.s32 3, %v65_v22 }
  0x2e   :  { %210 = vmatprep.mubr.f32.mxu0 %v2880_v0  ;;  %323 = vmatprep.mubr.f32.mxu1 %v2880_v0  ;;  %v434_v57 = vld [vmem:[#allocation3 + $0x1b0] sm:$0xff]  ;;  %v441_v62 = vld [vmem:[#allocation3 + $0x1e8] sm:$0xff]  ;;  %v3112_v1 = vpack.c.bf16 %v432_v53, %v428_v52  ;;  %v439_v3 = vld [vmem:[#allocation3 + $0x1d8] sm:$0xff]  ;;  %v74_v52 = vsub.s32 2, %v65_v22 }
  0x2f   :  { %2110 = vmatprep.subr.bf16.mxu0 %v3063_v21  ;;  %2142 = vmatprep.subr.bf16.mxu1 %v3067_v24  ;;  %v44_v63 = vld [vmem:[%s3522_s0 + $0x30] sm:$0xff]  ;;  %v443_v4 = vld [vmem:[#allocation3 + $0x1f8] sm:$0xff]  ;;  %v3116_v6 = vpack.c.bf16 %v434_v57, %v430_v56  ;;  %v436_v7 = vld [vmem:[#allocation3 + $0x1c0] sm:$0xff]  ;;  %v3120_v10 = vpack.c.bf16 %v441_v62, %v437_v60 }
  0x30   :  { %1982 = vmatmul.mubr.msk.f32.gmra.mrb[8].mxu0 %vm84_vm3, %v42_v27  ;;  %1992 = vmatmul.mubr.msk.f32.gmra.mrb[8].mxu1 %vm84_vm3, %v42_v27  ;;  %v440_v9 = vld [vmem:[#allocation3 + $0x1e0] sm:$0xff]  ;;  %v438_v12 = vld [vmem:[#allocation3 + $0x1d0] sm:$0xff]  ;;  %v3124_v14 = vpack.c.bf16 %v443_v4, %v439_v3  ;;  %v45_v16 = vld [vmem:[%s3522_s0 + $0x38] sm:$0xff] }
  0x31   :  { %2112 = vmatpush1.bf16.msra.mxu0 %v3074_v28  ;;  %2144 = vmatpush1.bf16.msra.mxu1 %v3078_v33  ;;  %v442_v13 = vld [vmem:[#allocation3 + $0x1f0] sm:$0xff]  ;;  %v3131_v17 = vpack.c.bf16 %v440_v9, %v436_v7  ;;  %v62_v25 = vld [vmem:[%s3525_s3] sm:$0xf] }
  0x32   :  { %216 = vmatprep.mubr.f32.mxu0 %v2880_v0  ;;  %329 = vmatprep.mubr.f32.mxu1 %v2880_v0  ;;  %v3135_v19 = vpack.c.bf16 %v442_v13, %v438_v12  ;;  %v3187_v27 = vrot.slane %v62_v25, %v66_v23  ;;  %v3189_v29 = vrot.slane %v62_v25, %v70_v26 }
  0x33   :  { %2114 = vmatprep.subr.bf16.mxu0 %v3082_v37  ;;  %2146 = vmatprep.subr.bf16.mxu1 %v3086_v41  ;;  %v3193_v49 = vrot.slane %v62_v25, %v78_v34  ;;  %v3196_v56 = vrot.slane %v62_v25, %v74_v52 }
  0x34   :  { %1983 = vmatmul.mubr.msk.f32.gmra.mrb[10].mxu0 %vm84_vm3, %v43_v45  ;;  %1993 = vmatmul.mubr.msk.f32.gmra.mrb[10].mxu1 %vm84_vm3, %v43_v45 }
  0x35   :  { %2116 = vmatpush1.bf16.msra.mxu0 %v3093_v46  ;;  %2148 = vmatpush1.bf16.msra.mxu1 %v3097_v50 }
  0x36   :  { %222 = vmatprep.mubr.f32.mxu0 %v2880_v0  ;;  %335 = vmatprep.mubr.f32.mxu1 %v2880_v0 }
  0x37   :  { %2118 = vmatprep.subr.bf16.mxu0 %v3101_v54  ;;  %2150 = vmatprep.subr.bf16.mxu1 %v3105_v59 }
  0x38   :  { %1984 = vmatmul.mubr.msk.f32.gmra.mrb[12].mxu0 %vm84_vm3, %v44_v63  ;;  %1994 = vmatmul.mubr.msk.f32.gmra.mrb[12].mxu1 %vm84_vm3, %v44_v63 }
  0x39   :  { %2120 = vmatpush1.bf16.msra.mxu0 %v3112_v1  ;;  %2152 = vmatpush1.bf16.msra.mxu1 %v3116_v6 }
  0x3a   :  { %228 = vmatprep.mubr.f32.mxu0 %v2880_v0  ;;  %341 = vmatprep.mubr.f32.mxu1 %v2880_v0 }
  0x3b   :  { %2122 = vmatprep.subr.bf16.mxu0 %v3120_v10  ;;  %2154 = vmatprep.subr.bf16.mxu1 %v3124_v14 }
  0x3c   :  { %1985 = vmatmul.mubr.msk.f32.gmra.mrb[14].mxu0 %vm84_vm3, %v45_v16  ;;  %1995 = vmatmul.mubr.msk.f32.gmra.mrb[14].mxu1 %vm84_vm3, %v45_v16 }
  0x3d   :  { %2124 = vmatpush1.bf16.msra.mxu0 %v3131_v17  ;;  %2156 = vmatpush1.bf16.msra.mxu1 %v3135_v19 }
  0x3e   :  { %515 = vmatprep.mubr.f32.mxu0 %v2880_v0  ;;  %586 = vmatprep.mubr.f32.mxu1 %v2880_v0 }
  0x3f   :  { %2158 = vmatprep.subr.bf16.mxu0 %v2990_v30  ;;  %2190 = vmatprep.subr.bf16.mxu1 %v2992_v31 }
  0x40   :  { %516 = vmatmul.mubr.f32.vlgmr.msra.gmra.mrb[0].mxu0 %v2880_v0  ;;  %587 = vmatmul.mubr.f32.vlgmr.msra.gmra.mrb[0].mxu1 %v2880_v0 }
  0x41   :  { %2160 = vmatpush1.bf16.msra.mxu0 %v2999_v36  ;;  %2192 = vmatpush1.bf16.msra.mxu1 %v3004_v39 }
  0x42   :  { %2162 = vmatprep.subr.bf16.mxu0 %v3007_v43  ;;  %2194 = vmatprep.subr.bf16.mxu1 %v3013_v48 }
  0x43   :  { %692 = vmatprep.mubr.f32.mxu0 %v2880_v0  ;;  %763 = vmatprep.mubr.f32.mxu1 %v2880_v0 }
  0x45   :  { %2164 = vmatpush1.bf16.msra.mxu0 %v3017_v51  ;;  %2196 = vmatpush1.bf16.msra.mxu1 %v3021_v55 }
  0x46   :  { %2166 = vmatprep.subr.bf16.mxu0 %v3025_v58  ;;  %2198 = vmatprep.subr.bf16.mxu1 %v3029_v61 }
  0x49   :  { %2168 = vmatpush1.bf16.msra.mxu0 %v3036_v2  ;;  %2200 = vmatpush1.bf16.msra.mxu1 %v3040_v5 }
  0x4a   :  { %2170 = vmatprep.subr.bf16.mxu0 %v3044_v8  ;;  %2202 = vmatprep.subr.bf16.mxu1 %v3048_v11 }
  0x4d   :  { %2172 = vmatpush1.bf16.msra.mxu0 %v3055_v15  ;;  %2204 = vmatpush1.bf16.msra.mxu1 %v3059_v18 }
  0x4e   :  { %2174 = vmatprep.subr.bf16.mxu0 %v3063_v21  ;;  %2206 = vmatprep.subr.bf16.mxu1 %v3067_v24 }
  0x51   :  { %2176 = vmatpush1.bf16.msra.mxu0 %v3074_v28  ;;  %2208 = vmatpush1.bf16.msra.mxu1 %v3078_v33 }
  0x52   :  { %2178 = vmatprep.subr.bf16.mxu0 %v3082_v37  ;;  %2210 = vmatprep.subr.bf16.mxu1 %v3086_v41 }
  0x55   :  { %2180 = vmatpush1.bf16.msra.mxu0 %v3093_v46  ;;  %2212 = vmatpush1.bf16.msra.mxu1 %v3097_v50 }
  0x56   :  { %2182 = vmatprep.subr.bf16.mxu0 %v3101_v54  ;;  %2214 = vmatprep.subr.bf16.mxu1 %v3105_v59 }
  0x59   :  { %2184 = vmatpush1.bf16.msra.mxu0 %v3112_v1  ;;  %2216 = vmatpush1.bf16.msra.mxu1 %v3116_v6 }
  0x5a   :  { %2186 = vmatprep.subr.bf16.mxu0 %v3120_v10  ;;  %2218 = vmatprep.subr.bf16.mxu1 %v3124_v14 }
  0x5d   :  { %2188 = vmatpush1.bf16.msra.mxu0 %v3131_v17  ;;  %2220 = vmatpush1.bf16.msra.mxu1 %v3135_v19 }
  0x5e   :  { %2222 = vmatprep.subr.bf16.mxu0 %v2990_v30  ;;  %2254 = vmatprep.subr.bf16.mxu1 %v2992_v31 }
 0x113   :  { %v517_v32 = vpop.f32.mrb[0].mxu0  ;;  %v588_v38 = vpop.f32.mrb[0].mxu1 }
 0x114   :  { %v2629_v35 = vadd.f32 %v517_v32, %v3187_v27  ;;  %v519_v40 = vpop.f32.mrb[1].mxu0  ;;  %v590_v44 = vpop.f32.mrb[1].mxu1  ;;  %v2645_v60 = vadd.f32 %v588_v38, %v3196_v56 }
 0x115   :  { %v2630_v42 = vadd.f32 %v519_v40, %v3189_v29  ;;  %v2646_v53 = vadd.f32 %v590_v44, %v3193_v49 }
 0x116   :  { %v1996_v45 = vmul.f32 -1.442695, %v2629_v35 }
 0x117   :  { %v1997_v47 = vmul.f32 -1.442695, %v2630_v42  ;;  %v1998_v57 = vmul.f32 -1.442695, %v2646_v53 }
 0x118   :  { %2701 = vpow2.f32 %v1996_v45 }
 0x119   :  { %2703 = vpow2.f32 %v1997_v47 }
 0x11a   :  { %2705 = vpow2.f32 %v1998_v57 }
 0x11b   :  { %2707 = vtanh.f32 %v2645_v60 }
 0x122   :  { %v2702_v62 = vpop.eup %2701 }
 0x123   :  { %v2704_v63 = vpop.eup %2703  ;;  %v600_v3 = vadd.f32 1.0, %v2702_v62 }
 0x124   :  { %v606_v4 = vadd.f32 1.0, %v2704_v63  ;;  %v2706_v7 = vpop.eup %2705 }
 0x125   :  { %2709 = vrcp.f32 %v600_v3  ;;  %v2708_v9 = vpop.eup %2707  ;;  %v613_v20 = vadd.f32 1.0, %v2706_v7 }
 0x126   :  { %2711 = vrcp.f32 %v606_v4 }
 0x127   :  { %2713 = vrcp.f32 %v613_v20 }
 0x12f   :  { %v2710_v12 = vpop.eup %2709 }
 0x130   :  { %v2712_v13 = vpop.eup %2711  ;;  %v617_v16 = vmul.f32 %v2710_v12, %v2708_v9 }
 0x131   :  { %v616_v22 = vmul.f32 0.0, %v2712_v13  ;;  %v2714_v25 = vpop.eup %2713 }
 0x133   :  { %v3199_v23 = vadd.f32 %v617_v16, %v616_v22 }
 0x135   :  { %2715 = vtanh.f32 %v3199_v23 }
 0x13f   :  { %v2716_v26 = vpop.eup %2715 }
 0x140   :  { %v620_v32 = vmul.f32 %v2716_v26, %v2714_v25 }
 0x142   :  { %693 = vmatmul.mubr.f32.vlgmr.msra.gmra.mrb[2].mxu0 %v620_v32  ;;  %764 = vmatmul.mubr.f32.vlgmr.msra.gmra.mrb[2].mxu1 %v620_v32 }
 0x143   :  { %2224 = vmatpush1.bf16.msra.mxu0 %v2999_v36  ;;  %2256 = vmatpush1.bf16.msra.mxu1 %v3004_v39 }
 0x144   :  { %2226 = vmatprep.subr.bf16.mxu0 %v3007_v43  ;;  %2258 = vmatprep.subr.bf16.mxu1 %v3013_v48 }
 0x145   :  { %869 = vmatprep.mubr.f32.mxu0 %v2880_v0  ;;  %940 = vmatprep.mubr.f32.mxu1 %v2880_v0 }
 0x147   :  { %2228 = vmatpush1.bf16.msra.mxu0 %v3017_v51  ;;  %2260 = vmatpush1.bf16.msra.mxu1 %v3021_v55 }
 0x148   :  { %2230 = vmatprep.subr.bf16.mxu0 %v3025_v58  ;;  %2262 = vmatprep.subr.bf16.mxu1 %v3029_v61 }
 0x14b   :  { %2232 = vmatpush1.bf16.msra.mxu0 %v3036_v2  ;;  %2264 = vmatpush1.bf16.msra.mxu1 %v3040_v5 }
 0x14c   :  { %2234 = vmatprep.subr.bf16.mxu0 %v3044_v8  ;;  %2266 = vmatprep.subr.bf16.mxu1 %v3048_v11 }
 0x14f   :  { %2236 = vmatpush1.bf16.msra.mxu0 %v3055_v15  ;;  %2268 = vmatpush1.bf16.msra.mxu1 %v3059_v18 }
 0x150   :  { %2238 = vmatprep.subr.bf16.mxu0 %v3063_v21  ;;  %2270 = vmatprep.subr.bf16.mxu1 %v3067_v24 }
 0x153   :  { %2240 = vmatpush1.bf16.msra.mxu0 %v3074_v28  ;;  %2272 = vmatpush1.bf16.msra.mxu1 %v3078_v33 }
 0x154   :  { %2242 = vmatprep.subr.bf16.mxu0 %v3082_v37  ;;  %2274 = vmatprep.subr.bf16.mxu1 %v3086_v41 }
 0x157   :  { %2244 = vmatpush1.bf16.msra.mxu0 %v3093_v46  ;;  %2276 = vmatpush1.bf16.msra.mxu1 %v3097_v50 }
 0x158   :  { %2246 = vmatprep.subr.bf16.mxu0 %v3101_v54  ;;  %2278 = vmatprep.subr.bf16.mxu1 %v3105_v59 }
 0x15b   :  { %2248 = vmatpush1.bf16.msra.mxu0 %v3112_v1  ;;  %2280 = vmatpush1.bf16.msra.mxu1 %v3116_v6 }
 0x15c   :  { %2250 = vmatprep.subr.bf16.mxu0 %v3120_v10  ;;  %2282 = vmatprep.subr.bf16.mxu1 %v3124_v14 }
 0x15f   :  { %2252 = vmatpush1.bf16.msra.mxu0 %v3131_v17  ;;  %2284 = vmatpush1.bf16.msra.mxu1 %v3135_v19 }
 0x160   :  { %2286 = vmatprep.subr.bf16.mxu0 %v2990_v30  ;;  %2318 = vmatprep.subr.bf16.mxu1 %v2992_v31 }
 0x215   :  { %v694_v34 = vpop.f32.mrb[2].mxu0  ;;  %v765_v35 = vpop.f32.mrb[2].mxu1 }
 0x216   :  { %v2631_v38 = vadd.f32 %v694_v34, %v3187_v27  ;;  %v696_v40 = vpop.f32.mrb[3].mxu0  ;;  %v767_v42 = vpop.f32.mrb[3].mxu1  ;;  %v2647_v57 = vadd.f32 %v765_v35, %v3196_v56 }
 0x217   :  { %v2632_v44 = vadd.f32 %v696_v40, %v3189_v29  ;;  %v2648_v52 = vadd.f32 %v767_v42, %v3193_v49 }
 0x218   :  { %v1999_v45 = vmul.f32 -1.442695, %v2631_v38 }
 0x219   :  { %v2000_v47 = vmul.f32 -1.442695, %v2632_v44  ;;  %v2001_v53 = vmul.f32 -1.442695, %v2648_v52 }
 0x21a   :  { %2717 = vpow2.f32 %v1999_v45 }
 0x21b   :  { %2719 = vpow2.f32 %v2000_v47 }
 0x21c   :  { %2721 = vpow2.f32 %v2001_v53 }
 0x21d   :  { %2723 = vtanh.f32 %v2647_v57 }
 0x224   :  { %v2718_v60 = vpop.eup %2717 }
 0x225   :  { %v2720_v62 = vpop.eup %2719  ;;  %v777_v63 = vadd.f32 1.0, %v2718_v60 }
 0x226   :  { %v783_v3 = vadd.f32 1.0, %v2720_v62  ;;  %v2722_v4 = vpop.eup %2721 }
 0x227   :  { %2725 = vrcp.f32 %v777_v63  ;;  %v2724_v7 = vpop.eup %2723  ;;  %v790_v16 = vadd.f32 1.0, %v2722_v4 }
 0x228   :  { %2727 = vrcp.f32 %v783_v3 }
 0x229   :  { %2729 = vrcp.f32 %v790_v16 }
 0x231   :  { %v2726_v9 = vpop.eup %2725 }
 0x232   :  { %v2728_v12 = vpop.eup %2727  ;;  %v794_v13 = vmul.f32 %v2726_v9, %v2724_v7 }
 0x233   :  { %v793_v20 = vmul.f32 %v2728_v12, %v3199_v23  ;;  %v2730_v25 = vpop.eup %2729 }
 0x235   :  { %v3241_v22 = vadd.f32 %v794_v13, %v793_v20 }
 0x237   :  { %2731 = vtanh.f32 %v3241_v22 }
 0x241   :  { %v2732_v26 = vpop.eup %2731 }
 0x242   :  { %v797_v32 = vmul.f32 %v2732_v26, %v2730_v25 }
 0x244   :  { %870 = vmatmul.mubr.f32.vlgmr.msra.gmra.mrb[4].mxu0 %v797_v32  ;;  %941 = vmatmul.mubr.f32.vlgmr.msra.gmra.mrb[4].mxu1 %v797_v32 }
 0x245   :  { %2288 = vmatpush1.bf16.msra.mxu0 %v2999_v36  ;;  %2320 = vmatpush1.bf16.msra.mxu1 %v3004_v39 }
 0x246   :  { %2290 = vmatprep.subr.bf16.mxu0 %v3007_v43  ;;  %2322 = vmatprep.subr.bf16.mxu1 %v3013_v48 }
 0x247   :  { %1046 = vmatprep.mubr.f32.mxu0 %v2880_v0  ;;  %1117 = vmatprep.mubr.f32.mxu1 %v2880_v0 }
 0x249   :  { %2292 = vmatpush1.bf16.msra.mxu0 %v3017_v51  ;;  %2324 = vmatpush1.bf16.msra.mxu1 %v3021_v55 }
 0x24a   :  { %2294 = vmatprep.subr.bf16.mxu0 %v3025_v58  ;;  %2326 = vmatprep.subr.bf16.mxu1 %v3029_v61 }
 0x24d   :  { %2296 = vmatpush1.bf16.msra.mxu0 %v3036_v2  ;;  %2328 = vmatpush1.bf16.msra.mxu1 %v3040_v5 }
 0x24e   :  { %2298 = vmatprep.subr.bf16.mxu0 %v3044_v8  ;;  %2330 = vmatprep.subr.bf16.mxu1 %v3048_v11 }
 0x251   :  { %2300 = vmatpush1.bf16.msra.mxu0 %v3055_v15  ;;  %2332 = vmatpush1.bf16.msra.mxu1 %v3059_v18 }
 0x252   :  { %2302 = vmatprep.subr.bf16.mxu0 %v3063_v21  ;;  %2334 = vmatprep.subr.bf16.mxu1 %v3067_v24 }
 0x255   :  { %2304 = vmatpush1.bf16.msra.mxu0 %v3074_v28  ;;  %2336 = vmatpush1.bf16.msra.mxu1 %v3078_v33 }
 0x256   :  { %2306 = vmatprep.subr.bf16.mxu0 %v3082_v37  ;;  %2338 = vmatprep.subr.bf16.mxu1 %v3086_v41 }
 0x259   :  { %2308 = vmatpush1.bf16.msra.mxu0 %v3093_v46  ;;  %2340 = vmatpush1.bf16.msra.mxu1 %v3097_v50 }
 0x25a   :  { %2310 = vmatprep.subr.bf16.mxu0 %v3101_v54  ;;  %2342 = vmatprep.subr.bf16.mxu1 %v3105_v59 }
 0x25d   :  { %2312 = vmatpush1.bf16.msra.mxu0 %v3112_v1  ;;  %2344 = vmatpush1.bf16.msra.mxu1 %v3116_v6 }
 0x25e   :  { %2314 = vmatprep.subr.bf16.mxu0 %v3120_v10  ;;  %2346 = vmatprep.subr.bf16.mxu1 %v3124_v14 }
 0x261   :  { %2316 = vmatpush1.bf16.msra.mxu0 %v3131_v17  ;;  %2348 = vmatpush1.bf16.msra.mxu1 %v3135_v19 }
 0x262   :  { %2350 = vmatprep.subr.bf16.mxu0 %v2990_v30  ;;  %2382 = vmatprep.subr.bf16.mxu1 %v2992_v31 }
 0x317   :  { %v871_v23 = vpop.f32.mrb[4].mxu0  ;;  %v942_v34 = vpop.f32.mrb[4].mxu1 }
 0x318   :  { %v2633_v35 = vadd.f32 %v871_v23, %v3187_v27  ;;  %v873_v38 = vpop.f32.mrb[5].mxu0  ;;  %v944_v40 = vpop.f32.mrb[5].mxu1  ;;  %v2649_v53 = vadd.f32 %v942_v34, %v3196_v56 }
 0x319   :  { %v2634_v42 = vadd.f32 %v873_v38, %v3189_v29  ;;  %v2650_v47 = vadd.f32 %v944_v40, %v3193_v49 }
 0x31a   :  { %v2002_v44 = vmul.f32 -1.442695, %v2633_v35 }
 0x31b   :  { %v2003_v45 = vmul.f32 -1.442695, %v2634_v42  ;;  %v2004_v52 = vmul.f32 -1.442695, %v2650_v47 }
 0x31c   :  { %2733 = vpow2.f32 %v2002_v44 }
 0x31d   :  { %2735 = vpow2.f32 %v2003_v45 }
 0x31e   :  { %2737 = vpow2.f32 %v2004_v52 }
 0x31f   :  { %2739 = vtanh.f32 %v2649_v53 }
 0x326   :  { %v2734_v57 = vpop.eup %2733 }
 0x327   :  { %v2736_v60 = vpop.eup %2735  ;;  %v954_v62 = vadd.f32 1.0, %v2734_v57 }
 0x328   :  { %v960_v63 = vadd.f32 1.0, %v2736_v60  ;;  %v2738_v3 = vpop.eup %2737 }
 0x329   :  { %2741 = vrcp.f32 %v954_v62  ;;  %v2740_v4 = vpop.eup %2739  ;;  %v967_v13 = vadd.f32 1.0, %v2738_v3 }
 0x32a   :  { %2743 = vrcp.f32 %v960_v63 }
 0x32b   :  { %2745 = vrcp.f32 %v967_v13 }
 0x333   :  { %v2742_v7 = vpop.eup %2741 }
 0x334   :  { %v2744_v9 = vpop.eup %2743  ;;  %v971_v12 = vmul.f32 %v2742_v7, %v2740_v4 }
 0x335   :  { %v970_v16 = vmul.f32 %v2744_v9, %v3241_v22  ;;  %v2746_v25 = vpop.eup %2745 }
 0x337   :  { %v3283_v20 = vadd.f32 %v971_v12, %v970_v16 }
 0x339   :  { %2747 = vtanh.f32 %v3283_v20 }
 0x343   :  { %v2748_v26 = vpop.eup %2747 }
 0x344   :  { %v974_v32 = vmul.f32 %v2748_v26, %v2746_v25 }
 0x346   :  { %1047 = vmatmul.mubr.f32.vlgmr.msra.gmra.mrb[6].mxu0 %v974_v32  ;;  %1118 = vmatmul.mubr.f32.vlgmr.msra.gmra.mrb[6].mxu1 %v974_v32 }
 0x347   :  { %2352 = vmatpush1.bf16.msra.mxu0 %v2999_v36  ;;  %2384 = vmatpush1.bf16.msra.mxu1 %v3004_v39 }
 0x348   :  { %2354 = vmatprep.subr.bf16.mxu0 %v3007_v43  ;;  %2386 = vmatprep.subr.bf16.mxu1 %v3013_v48 }
 0x349   :  { %1223 = vmatprep.mubr.f32.mxu0 %v2880_v0  ;;  %1294 = vmatprep.mubr.f32.mxu1 %v2880_v0 }
 0x34b   :  { %2356 = vmatpush1.bf16.msra.mxu0 %v3017_v51  ;;  %2388 = vmatpush1.bf16.msra.mxu1 %v3021_v55 }
 0x34c   :  { %2358 = vmatprep.subr.bf16.mxu0 %v3025_v58  ;;  %2390 = vmatprep.subr.bf16.mxu1 %v3029_v61 }
 0x34f   :  { %2360 = vmatpush1.bf16.msra.mxu0 %v3036_v2  ;;  %2392 = vmatpush1.bf16.msra.mxu1 %v3040_v5 }
 0x350   :  { %2362 = vmatprep.subr.bf16.mxu0 %v3044_v8  ;;  %2394 = vmatprep.subr.bf16.mxu1 %v3048_v11 }
 0x353   :  { %2364 = vmatpush1.bf16.msra.mxu0 %v3055_v15  ;;  %2396 = vmatpush1.bf16.msra.mxu1 %v3059_v18 }
 0x354   :  { %2366 = vmatprep.subr.bf16.mxu0 %v3063_v21  ;;  %2398 = vmatprep.subr.bf16.mxu1 %v3067_v24 }
 0x357   :  { %2368 = vmatpush1.bf16.msra.mxu0 %v3074_v28  ;;  %2400 = vmatpush1.bf16.msra.mxu1 %v3078_v33 }
 0x358   :  { %2370 = vmatprep.subr.bf16.mxu0 %v3082_v37  ;;  %2402 = vmatprep.subr.bf16.mxu1 %v3086_v41 }
 0x35b   :  { %2372 = vmatpush1.bf16.msra.mxu0 %v3093_v46  ;;  %2404 = vmatpush1.bf16.msra.mxu1 %v3097_v50 }
 0x35c   :  { %2374 = vmatprep.subr.bf16.mxu0 %v3101_v54  ;;  %2406 = vmatprep.subr.bf16.mxu1 %v3105_v59 }
 0x35f   :  { %2376 = vmatpush1.bf16.msra.mxu0 %v3112_v1  ;;  %2408 = vmatpush1.bf16.msra.mxu1 %v3116_v6 }
 0x360   :  { %2378 = vmatprep.subr.bf16.mxu0 %v3120_v10  ;;  %2410 = vmatprep.subr.bf16.mxu1 %v3124_v14 }
 0x363   :  { %2380 = vmatpush1.bf16.msra.mxu0 %v3131_v17  ;;  %2412 = vmatpush1.bf16.msra.mxu1 %v3135_v19 }
 0x364   :  { %2414 = vmatprep.subr.bf16.mxu0 %v2990_v30  ;;  %2446 = vmatprep.subr.bf16.mxu1 %v2992_v31 }
 0x419   :  { %v1048_v22 = vpop.f32.mrb[6].mxu0  ;;  %v1119_v23 = vpop.f32.mrb[6].mxu1 }
 0x41a   :  { %v2635_v34 = vadd.f32 %v1048_v22, %v3187_v27  ;;  %v1050_v35 = vpop.f32.mrb[7].mxu0  ;;  %v1121_v38 = vpop.f32.mrb[7].mxu1  ;;  %v2651_v52 = vadd.f32 %v1119_v23, %v3196_v56 }
 0x41b   :  { %v2636_v40 = vadd.f32 %v1050_v35, %v3189_v29  ;;  %v2652_v45 = vadd.f32 %v1121_v38, %v3193_v49 }
 0x41c   :  { %v2005_v42 = vmul.f32 -1.442695, %v2635_v34 }
 0x41d   :  { %v2006_v44 = vmul.f32 -1.442695, %v2636_v40  ;;  %v2007_v47 = vmul.f32 -1.442695, %v2652_v45 }
 0x41e   :  { %2749 = vpow2.f32 %v2005_v42 }
 0x41f   :  { %2751 = vpow2.f32 %v2006_v44 }
 0x420   :  { %2753 = vpow2.f32 %v2007_v47 }
 0x421   :  { %2755 = vtanh.f32 %v2651_v52 }
 0x428   :  { %v2750_v53 = vpop.eup %2749 }
 0x429   :  { %v2752_v57 = vpop.eup %2751  ;;  %v1131_v60 = vadd.f32 1.0, %v2750_v53 }
 0x42a   :  { %v1137_v62 = vadd.f32 1.0, %v2752_v57  ;;  %v2754_v63 = vpop.eup %2753 }
 0x42b   :  { %2757 = vrcp.f32 %v1131_v60  ;;  %v2756_v3 = vpop.eup %2755  ;;  %v1144_v12 = vadd.f32 1.0, %v2754_v63 }
 0x42c   :  { %2759 = vrcp.f32 %v1137_v62 }
 0x42d   :  { %2761 = vrcp.f32 %v1144_v12 }
 0x435   :  { %v2758_v4 = vpop.eup %2757 }
 0x436   :  { %v2760_v7 = vpop.eup %2759  ;;  %v1148_v9 = vmul.f32 %v2758_v4, %v2756_v3 }
 0x437   :  { %v1147_v13 = vmul.f32 %v2760_v7, %v3283_v20  ;;  %v2762_v25 = vpop.eup %2761 }
 0x439   :  { %v3325_v16 = vadd.f32 %v1148_v9, %v1147_v13 }
 0x43b   :  { %2763 = vtanh.f32 %v3325_v16 }
 0x445   :  { %v2764_v26 = vpop.eup %2763 }
 0x446   :  { %v1151_v32 = vmul.f32 %v2764_v26, %v2762_v25 }
 0x448   :  { %1224 = vmatmul.mubr.f32.vlgmr.msra.gmra.mrb[8].mxu0 %v1151_v32  ;;  %1295 = vmatmul.mubr.f32.vlgmr.msra.gmra.mrb[8].mxu1 %v1151_v32 }
 0x449   :  { %2416 = vmatpush1.bf16.msra.mxu0 %v2999_v36  ;;  %2448 = vmatpush1.bf16.msra.mxu1 %v3004_v39 }
 0x44a   :  { %2418 = vmatprep.subr.bf16.mxu0 %v3007_v43  ;;  %2450 = vmatprep.subr.bf16.mxu1 %v3013_v48 }
 0x44b   :  { %1400 = vmatprep.mubr.f32.mxu0 %v2880_v0  ;;  %1471 = vmatprep.mubr.f32.mxu1 %v2880_v0 }
 0x44d   :  { %2420 = vmatpush1.bf16.msra.mxu0 %v3017_v51  ;;  %2452 = vmatpush1.bf16.msra.mxu1 %v3021_v55 }
 0x44e   :  { %2422 = vmatprep.subr.bf16.mxu0 %v3025_v58  ;;  %2454 = vmatprep.subr.bf16.mxu1 %v3029_v61 }
 0x451   :  { %2424 = vmatpush1.bf16.msra.mxu0 %v3036_v2  ;;  %2456 = vmatpush1.bf16.msra.mxu1 %v3040_v5 }
 0x452   :  { %2426 = vmatprep.subr.bf16.mxu0 %v3044_v8  ;;  %2458 = vmatprep.subr.bf16.mxu1 %v3048_v11 }
 0x455   :  { %2428 = vmatpush1.bf16.msra.mxu0 %v3055_v15  ;;  %2460 = vmatpush1.bf16.msra.mxu1 %v3059_v18 }
 0x456   :  { %2430 = vmatprep.subr.bf16.mxu0 %v3063_v21  ;;  %2462 = vmatprep.subr.bf16.mxu1 %v3067_v24 }
 0x459   :  { %2432 = vmatpush1.bf16.msra.mxu0 %v3074_v28  ;;  %2464 = vmatpush1.bf16.msra.mxu1 %v3078_v33 }
 0x45a   :  { %2434 = vmatprep.subr.bf16.mxu0 %v3082_v37  ;;  %2466 = vmatprep.subr.bf16.mxu1 %v3086_v41 }
 0x45d   :  { %2436 = vmatpush1.bf16.msra.mxu0 %v3093_v46  ;;  %2468 = vmatpush1.bf16.msra.mxu1 %v3097_v50 }
 0x45e   :  { %2438 = vmatprep.subr.bf16.mxu0 %v3101_v54  ;;  %2470 = vmatprep.subr.bf16.mxu1 %v3105_v59 }
 0x461   :  { %2440 = vmatpush1.bf16.msra.mxu0 %v3112_v1  ;;  %2472 = vmatpush1.bf16.msra.mxu1 %v3116_v6 }
 0x462   :  { %2442 = vmatprep.subr.bf16.mxu0 %v3120_v10  ;;  %2474 = vmatprep.subr.bf16.mxu1 %v3124_v14 }
 0x465   :  { %2444 = vmatpush1.bf16.msra.mxu0 %v3131_v17  ;;  %2476 = vmatpush1.bf16.msra.mxu1 %v3135_v19 }
 0x466   :  { %2478 = vmatprep.subr.bf16.mxu0 %v2990_v30  ;;  %2510 = vmatprep.subr.bf16.mxu1 %v2992_v31 }
 0x51b   :  { %v1225_v20 = vpop.f32.mrb[8].mxu0  ;;  %v1296_v22 = vpop.f32.mrb[8].mxu1 }
 0x51c   :  { %v2637_v23 = vadd.f32 %v1225_v20, %v3187_v27  ;;  %v1227_v34 = vpop.f32.mrb[9].mxu0  ;;  %v1298_v35 = vpop.f32.mrb[9].mxu1  ;;  %v2653_v47 = vadd.f32 %v1296_v22, %v3196_v56 }
 0x51d   :  { %v2638_v38 = vadd.f32 %v1227_v34, %v3189_v29  ;;  %v2654_v44 = vadd.f32 %v1298_v35, %v3193_v49 }
 0x51e   :  { %v2008_v40 = vmul.f32 -1.442695, %v2637_v23 }
 0x51f   :  { %v2009_v42 = vmul.f32 -1.442695, %v2638_v38  ;;  %v2010_v45 = vmul.f32 -1.442695, %v2654_v44 }
 0x520   :  { %2765 = vpow2.f32 %v2008_v40 }
 0x521   :  { %2767 = vpow2.f32 %v2009_v42 }
 0x522   :  { %2769 = vpow2.f32 %v2010_v45 }
 0x523   :  { %2771 = vtanh.f32 %v2653_v47 }
 0x52a   :  { %v2766_v52 = vpop.eup %2765 }
 0x52b   :  { %v2768_v53 = vpop.eup %2767  ;;  %v1308_v57 = vadd.f32 1.0, %v2766_v52 }
 0x52c   :  { %v1314_v60 = vadd.f32 1.0, %v2768_v53  ;;  %v2770_v62 = vpop.eup %2769 }
 0x52d   :  { %2773 = vrcp.f32 %v1308_v57  ;;  %v2772_v63 = vpop.eup %2771  ;;  %v1321_v9 = vadd.f32 1.0, %v2770_v62 }
 0x52e   :  { %2775 = vrcp.f32 %v1314_v60 }
 0x52f   :  { %2777 = vrcp.f32 %v1321_v9 }
 0x537   :  { %v2774_v3 = vpop.eup %2773 }
 0x538   :  { %v2776_v4 = vpop.eup %2775  ;;  %v1325_v7 = vmul.f32 %v2774_v3, %v2772_v63 }
 0x539   :  { %v1324_v12 = vmul.f32 %v2776_v4, %v3325_v16  ;;  %v2778_v25 = vpop.eup %2777 }
 0x53b   :  { %v3367_v13 = vadd.f32 %v1325_v7, %v1324_v12 }
 0x53d   :  { %2779 = vtanh.f32 %v3367_v13 }
 0x547   :  { %v2780_v26 = vpop.eup %2779 }
 0x548   :  { %v1328_v32 = vmul.f32 %v2780_v26, %v2778_v25  ;;  %v1863_v26 = vld [vmem:[%s3526_s4 + $0x18] sm:$0xff] }
 0x54a   :  { %1401 = vmatmul.mubr.f32.vlgmr.msra.gmra.mrb[10].mxu0 %v1328_v32  ;;  %1472 = vmatmul.mubr.f32.vlgmr.msra.gmra.mrb[10].mxu1 %v1328_v32 }
 0x54b   :  { %2480 = vmatpush1.bf16.msra.mxu0 %v2999_v36  ;;  %2512 = vmatpush1.bf16.msra.mxu1 %v3004_v39 }
 0x54c   :  { %2482 = vmatprep.subr.bf16.mxu0 %v3007_v43  ;;  %2514 = vmatprep.subr.bf16.mxu1 %v3013_v48 }
 0x54d   :  { %1577 = vmatprep.mubr.f32.mxu0 %v2880_v0  ;;  %1648 = vmatprep.mubr.f32.mxu1 %v2880_v0 }
 0x54f   :  { %2484 = vmatpush1.bf16.msra.mxu0 %v3017_v51  ;;  %2516 = vmatpush1.bf16.msra.mxu1 %v3021_v55 }
 0x550   :  { %2486 = vmatprep.subr.bf16.mxu0 %v3025_v58  ;;  %2518 = vmatprep.subr.bf16.mxu1 %v3029_v61 }
 0x553   :  { %2488 = vmatpush1.bf16.msra.mxu0 %v3036_v2  ;;  %2520 = vmatpush1.bf16.msra.mxu1 %v3040_v5 }
 0x554   :  { %2490 = vmatprep.subr.bf16.mxu0 %v3044_v8  ;;  %2522 = vmatprep.subr.bf16.mxu1 %v3048_v11 }
 0x557   :  { %2492 = vmatpush1.bf16.msra.mxu0 %v3055_v15  ;;  %2524 = vmatpush1.bf16.msra.mxu1 %v3059_v18 }
 0x558   :  { %2494 = vmatprep.subr.bf16.mxu0 %v3063_v21  ;;  %2526 = vmatprep.subr.bf16.mxu1 %v3067_v24 }
 0x55b   :  { %2496 = vmatpush1.bf16.msra.mxu0 %v3074_v28  ;;  %2528 = vmatpush1.bf16.msra.mxu1 %v3078_v33 }
 0x55c   :  { %2498 = vmatprep.subr.bf16.mxu0 %v3082_v37  ;;  %2530 = vmatprep.subr.bf16.mxu1 %v3086_v41 }
 0x55f   :  { %2500 = vmatpush1.bf16.msra.mxu0 %v3093_v46  ;;  %2532 = vmatpush1.bf16.msra.mxu1 %v3097_v50 }
 0x560   :  { %2502 = vmatprep.subr.bf16.mxu0 %v3101_v54  ;;  %2534 = vmatprep.subr.bf16.mxu1 %v3105_v59 }
 0x563   :  { %2504 = vmatpush1.bf16.msra.mxu0 %v3112_v1  ;;  %2536 = vmatpush1.bf16.msra.mxu1 %v3116_v6 }
 0x564   :  { %2506 = vmatprep.subr.bf16.mxu0 %v3120_v10  ;;  %2538 = vmatprep.subr.bf16.mxu1 %v3124_v14 }
 0x567   :  { %2508 = vmatpush1.bf16.msra.mxu0 %v3131_v17  ;;  %2540 = vmatpush1.bf16.msra.mxu1 %v3135_v19 }
 0x568   :  { %2542 = vmatprep.subr.bf16.mxu0 %v2990_v30  ;;  %2574 = vmatprep.subr.bf16.mxu1 %v2992_v31 }
 0x61d   :  { %v1402_v16 = vpop.f32.mrb[10].mxu0  ;;  %v1473_v20 = vpop.f32.mrb[10].mxu1 }
 0x61e   :  { %v2639_v22 = vadd.f32 %v1402_v16, %v3187_v27  ;;  %v1404_v23 = vpop.f32.mrb[11].mxu0  ;;  %v1475_v34 = vpop.f32.mrb[11].mxu1  ;;  %v2655_v45 = vadd.f32 %v1473_v20, %v3196_v56  ;;  %v1864_v16 = vld [vmem:[%s3526_s4 + $0x20] sm:$0xff]  ;;  %v1865_v20 = vld [vmem:[%s3526_s4 + $0x28] sm:$0xff] }
 0x61f   :  { %v2640_v35 = vadd.f32 %v1404_v23, %v3189_v29  ;;  %v2656_v42 = vadd.f32 %v1475_v34, %v3193_v49  ;;  %v1866_v23 = vld [vmem:[%s3526_s4 + $0x30] sm:$0xff]  ;;  %v1867_v34 = vld [vmem:[%s3526_s4 + $0x38] sm:$0xff] }
 0x620   :  { %v2011_v38 = vmul.f32 -1.442695, %v2639_v22  ;;  %v2612_v22 = vpack.c.bf16 %v1865_v20, %v1864_v16 }
 0x621   :  { %v2012_v40 = vmul.f32 -1.442695, %v2640_v35  ;;  %v2013_v44 = vmul.f32 -1.442695, %v2656_v42  ;;  %v2615_v35 = vpack.c.bf16 %v1867_v34, %v1866_v23 }
 0x622   :  { %2781 = vpow2.f32 %v2011_v38  ;;  %v1868_v38 = vld [vmem:[%s3526_s4 + $0x40] sm:$0xff] }
 0x623   :  { %2783 = vpow2.f32 %v2012_v40  ;;  %v1869_v40 = vld [vmem:[%s3526_s4 + $0x48] sm:$0xff] }
 0x624   :  { %2785 = vpow2.f32 %v2013_v44  ;;  %v2618_v42 = vpack.c.bf16 %v1869_v40, %v1868_v38  ;;  %v1870_v44 = vld [vmem:[%s3526_s4 + $0x50] sm:$0xff] }
 0x625   :  { %2787 = vtanh.f32 %v2655_v45  ;;  %v1871_v45 = vld [vmem:[%s3526_s4 + $0x58] sm:$0xff] }
 0x62c   :  { %v2782_v30 = vpop.eup %2781 }
 0x62d   :  { %v2784_v47 = vpop.eup %2783  ;;  %v1485_v31 = vadd.f32 1.0, %v2782_v30  ;;  %v1872_v30 = vld [vmem:[%s3526_s4 + $0x60] sm:$0xff] }
 0x62e   :  { %v1491_v52 = vadd.f32 1.0, %v2784_v47  ;;  %v2786_v53 = vpop.eup %2785  ;;  %v2621_v47 = vpack.c.bf16 %v1871_v45, %v1870_v44 }
 0x62f   :  { %2789 = vrcp.f32 %v1485_v31  ;;  %v2788_v57 = vpop.eup %2787  ;;  %v1498_v3 = vadd.f32 1.0, %v2786_v53  ;;  %v1873_v31 = vld [vmem:[%s3526_s4 + $0x68] sm:$0xff]  ;;  %v1874_v53 = vld [vmem:[%s3526_s4 + $0x70] sm:$0xff] }
 0x630   :  { %2791 = vrcp.f32 %v1491_v52  ;;  %v2624_v52 = vpack.c.bf16 %v1873_v31, %v1872_v30 }
 0x631   :  { %2793 = vrcp.f32 %v1498_v3 }
 0x639   :  { %v2790_v60 = vpop.eup %2789 }
 0x63a   :  { %v2792_v62 = vpop.eup %2791  ;;  %v1502_v63 = vmul.f32 %v2790_v60, %v2788_v57  ;;  %v1875_v57 = vld [vmem:[%s3526_s4 + $0x78] sm:$0xff] }
 0x63b   :  { %v1501_v4 = vmul.f32 %v2792_v62, %v3367_v13  ;;  %v2794_v9 = vpop.eup %2793  ;;  %v1862_v13 = vld [vmem:[%s3526_s4 + $0x10] sm:$0xff]  ;;  %v2627_v60 = vpack.c.bf16 %v1875_v57, %v1874_v53 }
 0x63c   :  { %v2609_v32 = vpack.c.bf16 %v1863_v26, %v1862_v13 }
 0x63d   :  { %v3409_v7 = vadd.f32 %v1502_v63, %v1501_v4 }
 0x63f   :  { %2795 = vtanh.f32 %v3409_v7 }
 0x649   :  { %v2796_v12 = vpop.eup %2795 }
 0x64a   :  { %v1505_v25 = vmul.f32 %v2796_v12, %v2794_v9 }
 0x64c   :  { %1578 = vmatmul.mubr.f32.vlgmr.msra.gmra.mrb[12].mxu0 %v1505_v25  ;;  %1649 = vmatmul.mubr.f32.vlgmr.msra.gmra.mrb[12].mxu1 %v1505_v25 }
 0x64d   :  { %2544 = vmatpush1.bf16.msra.mxu0 %v2999_v36  ;;  %2576 = vmatpush1.bf16.msra.mxu1 %v3004_v39 }
 0x64e   :  { %2546 = vmatprep.subr.bf16.mxu0 %v3007_v43  ;;  %2578 = vmatprep.subr.bf16.mxu1 %v3013_v48 }
 0x64f   :  { %1754 = vmatprep.mubr.f32.mxu0 %v2880_v0  ;;  %1825 = vmatprep.mubr.f32.mxu1 %v2880_v0 }
 0x651   :  { %2548 = vmatpush1.bf16.msra.mxu0 %v3017_v51  ;;  %2580 = vmatpush1.bf16.msra.mxu1 %v3021_v55 }
 0x652   :  { %2550 = vmatprep.subr.bf16.mxu0 %v3025_v58  ;;  %2582 = vmatprep.subr.bf16.mxu1 %v3029_v61 }
 0x655   :  { %2552 = vmatpush1.bf16.msra.mxu0 %v3036_v2  ;;  %2584 = vmatpush1.bf16.msra.mxu1 %v3040_v5 }
 0x656   :  { %2554 = vmatprep.subr.bf16.mxu0 %v3044_v8  ;;  %2586 = vmatprep.subr.bf16.mxu1 %v3048_v11 }
 0x659   :  { %2556 = vmatpush1.bf16.msra.mxu0 %v3055_v15  ;;  %2588 = vmatpush1.bf16.msra.mxu1 %v3059_v18 }
 0x65a   :  { %2558 = vmatprep.subr.bf16.mxu0 %v3063_v21  ;;  %2590 = vmatprep.subr.bf16.mxu1 %v3067_v24 }
 0x65d   :  { %2560 = vmatpush1.bf16.msra.mxu0 %v3074_v28  ;;  %2592 = vmatpush1.bf16.msra.mxu1 %v3078_v33 }
 0x65e   :  { %2562 = vmatprep.subr.bf16.mxu0 %v3082_v37  ;;  %2594 = vmatprep.subr.bf16.mxu1 %v3086_v41 }
 0x661   :  { %2564 = vmatpush1.bf16.msra.mxu0 %v3093_v46  ;;  %2596 = vmatpush1.bf16.msra.mxu1 %v3097_v50 }
 0x662   :  { %2566 = vmatprep.subr.bf16.mxu0 %v3101_v54  ;;  %2598 = vmatprep.subr.bf16.mxu1 %v3105_v59 }
 0x665   :  { %2568 = vmatpush1.bf16.msra.mxu0 %v3112_v1  ;;  %2600 = vmatpush1.bf16.msra.mxu1 %v3116_v6 }
 0x666   :  { %2570 = vmatprep.subr.bf16.mxu0 %v3120_v10  ;;  %2602 = vmatprep.subr.bf16.mxu1 %v3124_v14  ;;  %v1860_v10 = vld [vmem:[%s3526_s4] sm:$0xff]  ;;  %v1861_v14 = vld [vmem:[%s3526_s4 + $0x8] sm:$0xff] }
 0x669   :  { %2572 = vmatpush1.bf16.msra.mxu0 %v3131_v17  ;;  %2604 = vmatpush1.bf16.msra.mxu1 %v3135_v19  ;;  %v2606_v17 = vpack.c.bf16 %v1861_v14, %v1860_v10  ;;  %v2882_v19 = vmov 0.0|0.0  }
 0x66a   :  { %2605 = vmatprep.subr.bf16.mxu0 %v2882_v19 }
 0x71f   :  { %v1579_v36 = vpop.f32.mrb[12].mxu0  ;;  %v1650_v39 = vpop.f32.mrb[12].mxu1 }
 0x720   :  { %v2641_v43 = vadd.f32 %v1579_v36, %v3187_v27  ;;  %v1581_v48 = vpop.f32.mrb[13].mxu0  ;;  %v1652_v51 = vpop.f32.mrb[13].mxu1  ;;  %v2657_v8 = vadd.f32 %v1650_v39, %v3196_v56 }
 0x721   :  { %v2642_v55 = vadd.f32 %v1581_v48, %v3189_v29  ;;  %v2658_v2 = vadd.f32 %v1652_v51, %v3193_v49 }
 0x722   :  { %v2014_v58 = vmul.f32 -1.442695, %v2641_v43 }
 0x723   :  { %v2015_v61 = vmul.f32 -1.442695, %v2642_v55  ;;  %v2016_v5 = vmul.f32 -1.442695, %v2658_v2 }
 0x724   :  { %2797 = vpow2.f32 %v2014_v58 }
 0x725   :  { %2799 = vpow2.f32 %v2015_v61 }
 0x726   :  { %2801 = vpow2.f32 %v2016_v5 }
 0x727   :  { %2803 = vtanh.f32 %v2657_v8 }
 0x72e   :  { %v2798_v11 = vpop.eup %2797 }
 0x72f   :  { %v2800_v15 = vpop.eup %2799  ;;  %v1662_v18 = vadd.f32 1.0, %v2798_v11 }
 0x730   :  { %v1668_v21 = vadd.f32 1.0, %v2800_v15  ;;  %v2802_v24 = vpop.eup %2801 }
 0x731   :  { %2805 = vrcp.f32 %v1662_v18  ;;  %v2804_v28 = vpop.eup %2803  ;;  %v1675_v46 = vadd.f32 1.0, %v2802_v24  ;;  %v2020_v18 = vld [vmem:[%s3527_s5] ss:$0 sm:$0xff] }
 0x732   :  { %2807 = vrcp.f32 %v1668_v21 }
 0x733   :  { %2809 = vrcp.f32 %v1675_v46 }
 0x73b   :  { %v2806_v33 = vpop.eup %2805 }
 0x73c   :  { %v2808_v37 = vpop.eup %2807  ;;  %v1679_v41 = vmul.f32 %v2806_v33, %v2804_v28 }
 0x73d   :  { %v1678_v50 = vmul.f32 %v2808_v37, %v3409_v7  ;;  %v2810_v59 = vpop.eup %2809 }
 0x73f   :  { %v3449_v54 = vadd.f32 %v1679_v41, %v1678_v50 }
 0x741   :  { %2811 = vtanh.f32 %v3449_v54 }
 0x74b   :  { %v2812_v1 = vpop.eup %2811 }
 0x74c   :  { %v1682_v6 = vmul.f32 %v2812_v1, %v2810_v59 }
 0x74e   :  { %1755 = vmatmul.mubr.f32.vlgmr.msra.gmra.mrb[14].mxu0 %v1682_v6  ;;  %1826 = vmatmul.mubr.f32.vlgmr.msra.gmra.mrb[14].mxu1 %v1682_v6 }
 0x74f   :  { %2607 = vmatpush3.bf16.msra.mxu0 %v2606_v17  ;;  %2070 = vmatprep.mubr.msk.f32.mxu0 %vm2883_vm4, %v2880_v0 }
 0x750   :  { %2608 = vmatprep.subr.bf16.mxu0 %v2882_v19 }
 0x753   :  { %2610 = vmatpush3.bf16.msra.mxu0 %v2609_v32 }
 0x754   :  { %2611 = vmatprep.subr.bf16.mxu0 %v2882_v19 }
 0x757   :  { %2613 = vmatpush3.bf16.msra.mxu0 %v2612_v22 }
 0x758   :  { %2614 = vmatprep.subr.bf16.mxu0 %v2882_v19 }
 0x75b   :  { %2616 = vmatpush3.bf16.msra.mxu0 %v2615_v35 }
 0x75c   :  { %2617 = vmatprep.subr.bf16.mxu0 %v2882_v19 }
 0x75f   :  { %2619 = vmatpush3.bf16.msra.mxu0 %v2618_v42 }
 0x760   :  { %2620 = vmatprep.subr.bf16.mxu0 %v2882_v19 }
 0x763   :  { %2622 = vmatpush3.bf16.msra.mxu0 %v2621_v47 }
 0x764   :  { %2623 = vmatprep.subr.bf16.mxu0 %v2882_v19 }
 0x767   :  { %2625 = vmatpush3.bf16.msra.mxu0 %v2624_v52 }
 0x768   :  { %2626 = vmatprep.subr.bf16.mxu0 %v2882_v19 }
 0x76b   :  { %2628 = vmatpush3.bf16.msra.mxu0 %v2627_v60 }
 0x821   :  { %v1756_v62 = vpop.f32.mrb[14].mxu0  ;;  %v1827_v63 = vpop.f32.mrb[14].mxu1 }
 0x822   :  { %v2643_v3 = vadd.f32 %v1756_v62, %v3187_v27  ;;  %v1758_v0 = vpop.f32.mrb[15].mxu0  ;;  %v1829_v4 = vpop.f32.mrb[15].mxu1  ;;  %v2659_v39 = vadd.f32 %v1827_v63, %v3196_v56 }
 0x823   :  { %v2644_v7 = vadd.f32 %v1758_v0, %v3189_v29  ;;  %v2660_v25 = vadd.f32 %v1829_v4, %v3193_v49 }
 0x824   :  { %v2017_v9 = vmul.f32 -1.442695, %v2643_v3 }
 0x825   :  { %v2018_v12 = vmul.f32 -1.442695, %v2644_v7  ;;  %v2019_v36 = vmul.f32 -1.442695, %v2660_v25 }
 0x826   :  { %2813 = vpow2.f32 %v2017_v9 }
 0x827   :  { %2815 = vpow2.f32 %v2018_v12 }
 0x828   :  { %2817 = vpow2.f32 %v2019_v36 }
 0x829   :  { %2819 = vtanh.f32 %v2659_v39 }
 0x830   :  { %v2814_v43 = vpop.eup %2813 }
 0x831   :  { %v2816_v48 = vpop.eup %2815  ;;  %v1839_v51 = vadd.f32 1.0, %v2814_v43 }
 0x832   :  { %v1845_v55 = vadd.f32 1.0, %v2816_v48  ;;  %v2818_v27 = vpop.eup %2817 }
 0x833   :  { %2821 = vrcp.f32 %v1839_v51  ;;  %v2820_v58 = vpop.eup %2819  ;;  %v1852_v5 = vadd.f32 1.0, %v2818_v27 }
 0x834   :  { %2823 = vrcp.f32 %v1845_v55 }
 0x835   :  { %2825 = vrcp.f32 %v1852_v5 }
 0x83d   :  { %v2822_v29 = vpop.eup %2821 }
 0x83e   :  { %v2824_v61 = vpop.eup %2823  ;;  %v1856_v2 = vmul.f32 %v2822_v29, %v2820_v58 }
 0x83f   :  { %v1855_v8 = vmul.f32 %v2824_v61, %v3449_v54  ;;  %v2826_v56 = vpop.eup %2825 }
 0x841   :  { %v1857_v49 = vadd.f32 %v1856_v2, %v1855_v8 }
 0x843   :  { %2827 = vtanh.f32 %v1857_v49 }
 0x84d   :  { %v2828_v11 = vpop.eup %2827 }
 0x84e   :  { %v1859_v15 = vmul.f32 %v2828_v11, %v2826_v56 }
 0x850   :  { %2071 = vmatmul.mubr.f32.vlgmr.msra.gmra.mrb[16].mxu0 %v1859_v15 }
 0x923   :  { %v1949_v21 = vpop.f32.mrb[16].mxu0 }
 0x924   :  { %v1950_v24 = vadd.f32 %v2020_v18, %v1949_v21  ;;  %v2072_v28 = vpop.f32.mrb[17].mxu0 }
 0x926   :  { %1953 = vst.msk [vmem:[#allocation6] sm:$0xff] %vm84_vm3, %v1950_v24 }
 0x927   :  { %2862 = shalt.err (!%p2859_p12)
}
 0x928   :  { %s2863_s1 = scalar_lea.hbm %s3528_s6, 128 }
 0x929   :  { %p2864_p13 = scmp.ne.s32.totalorder %s3528_s6, %s2863_s1  ;;  %p2867_p0 = scmp.lt.u32.totalorder %s2863_s1, %s3528_s6 }
 0x92b   :  { %p2869_p1 = pnand %p2867_p0, %p2864_p13 }
 0x92d   :  { %2872 = shalt.err (!%p2869_p1)
}
 0x92e   :  { %1963 = dma.vmem_to_hbm [thread:$0]  %s1961_s14, 128, %s3528_s6, [#allocation5]  }
 0x92f   :  { %2875 = dma.done.wait [#allocation5], 128  }
 0x930   :  { %2876 = vsyncadd [#allocation5], 4294967168 }
 0x931   :  { %1967 = vsyncpa [#allocation4], 1 }
 0x932   :  { %1968 = vsyncpa [#allocation5], 1 }

</bundles_post_ra>
